<compile_context>
chip_gen: v6e
topology: v6e:2x2x1
jax: 0.10.0
libtpu: 0.0.40
codegen_flags: <defaults>
</compile_context>

<pallas_src>
import functools

import jax
import jax.numpy as jnp
import numpy as np
from jax import lax
from jax.experimental import pallas as pl
from jax.experimental.pallas import tpu as pltpu

TOP_K = 50
MIN_TOKENS_TO_KEEP = 5
_LANES = 128          # TPU lane width
_OUT_W = 128          # lane-dense output width (>= top_k)


def _penalty_sample_kernel(x_ref, ids_ref, topp_ref, temp_ref, pen_ref,
                           probs_ref, tok_ref, work_ref, gsm_ref, *,
                           top_k, min_keep, rpg, n_id_steps, id_batch,
                           two_level):
    R, C = work_ref.shape                     # sublane/lane-dense (R, 128)
    G = R // rpg                              # number of sublane groups
    NEG = jnp.float32(-jnp.inf)

    penalty = pen_ref[0]
    inv_pen = 1.0 / penalty                   # scalar reciprocal (no tile divide)
    top_p = topp_ref[0]
    temperature = temp_ref[0]

    # ---------------- phase 1: repetition penalty, per row-block -------------
    # hit mask built with a fori_loop over id batches (id_batch ids per pass);
    # the (rpg,128) flat-index tile stays resident across the whole loop.
    lflat = (lax.broadcasted_iota(jnp.int32, (rpg, C), 0) * C +
             lax.broadcasted_iota(jnp.int32, (rpg, C), 1))
    cand_rows = []
    for g in range(G):                        # static unroll, G is small
        base = g * rpg
        rowg = x_ref[pl.ds(base, rpg), :].astype(jnp.float32)
        flatg = lflat + base * C              # global flat vocab indices

        def id_body(t, hit, flatg=flatg):
            for u in range(id_batch):
                tid = ids_ref[t * id_batch + u]      # -1 padding never matches
                hit = jnp.where(flatg == tid, jnp.int32(1), hit)
            return hit

        hit = lax.fori_loop(0, n_id_steps, id_body,
                            jnp.zeros((rpg, C), jnp.int32))
        pen_rows = jnp.where(rowg < 0.0, rowg * penalty, rowg * inv_pen)
        workg = jnp.where(hit > 0, pen_rows, rowg)
        work_ref[pl.ds(base, rpg), :] = workg
        if two_level:
            cand_rows.append(jnp.max(workg, axis=0, keepdims=True))

    # ---------------- phase 2: exact top-k ----------------------------------
    k_lane = lax.broadcasted_iota(jnp.int32, (1, _OUT_W), 1)
    vals0 = jnp.full((1, _OUT_W), NEG, jnp.float32)   # lanes >= top_k stay -inf
    toks0 = jnp.zeros((1, _OUT_W), jnp.int32)

    if two_level:
        cand0 = cand_rows[0] if G == 1 else jnp.concatenate(cand_rows, axis=0)
        g_iota = lax.broadcasted_iota(jnp.int32, (G, C), 0)

        def body(k, carry):
            cand, vals, toks = carry
            m = jnp.max(cand)                                    # global max
            g_v = jnp.min(jnp.where(cand == m, g_iota, jnp.int32(G)))
            g_v = jnp.minimum(g_v, jnp.int32(G - 1))             # OOB guard
            gsm_ref[0] = g_v                 # vector->scalar bounce via SMEM
            g = gsm_ref[0]
            base = pl.multiple_of(g * rpg, 8)
            grp = work_ref[pl.ds(base, rpg), :]                  # winning group
            lwin = jnp.min(jnp.where(grp == m, lflat, jnp.int32(rpg * C)))
            grp_new = jnp.where(lflat == lwin, NEG, grp)         # mask winner
            work_ref[pl.ds(base, rpg), :] = grp_new
            new_row = jnp.max(grp_new, axis=0, keepdims=True)
            cand = jnp.where(g_iota == g, new_row, cand)         # refresh row g
            idx = lwin + base * C                                # flat token id
            vals = jnp.where(k_lane == k, m, vals)
            toks = jnp.where(k_lane == k, idx, toks)
            return cand, vals, toks

        _, vals, toks = lax.fori_loop(0, top_k, body, (cand0, vals0, toks0))
    else:
        # Fallback: full-tile iterative argmax (previous, known-good design).
        flat = (lax.broadcasted_iota(jnp.int32, (R, C), 0) * C +
                lax.broadcasted_iota(jnp.int32, (R, C), 1))
        mat0 = work_ref[...]
        Vp = R * C

        def body(k, carry):
            mat, vals, toks = carry
            m = jnp.max(mat)
            idx = jnp.min(jnp.where(mat == m, flat, jnp.int32(Vp)))
            vals = jnp.where(k_lane == k, m, vals)
            toks = jnp.where(k_lane == k, idx, toks)
            mat = jnp.where(flat == idx, NEG, mat)
            return mat, vals, toks

        _, vals, toks = lax.fori_loop(0, top_k, body, (mat0, vals0, toks0))

    # ---------------- phase 3: temperature / softmax / top-p / re-softmax ----
    logits = vals / temperature                     # -inf padding stays -inf
    m1 = jnp.max(logits, axis=1, keepdims=True)
    e1 = jnp.exp(logits - m1)                       # padded lanes -> exactly 0
    p1 = e1 / jnp.sum(e1, axis=1, keepdims=True)

    # Inclusive prefix sum over lanes: log-step Hillis-Steele scan on the XLU.
    cum = p1
    d = 1
    while d < _OUT_W:
        shifted = pltpu.roll(cum, shift=d, axis=1)
        cum = cum + jnp.where(k_lane >= d, shifted, 0.0)
        d *= 2

    mask = (cum < top_p) | (k_lane < min_keep)      # keep_matrix
    filtered = jnp.where(mask, logits, jnp.float32(-1000.0))
    filtered = jnp.where(k_lane < top_k, filtered, NEG)   # padded lanes -> 0

    m2 = jnp.max(filtered, axis=1, keepdims=True)
    e2 = jnp.exp(filtered - m2)
    probs_ref[...] = e2 / jnp.sum(e2, axis=1, keepdims=True)
    tok_ref[...] = toks


_TWO_LEVEL_OK = True   # flipped to False if the fast path fails to lower


def penalty_sample_head(m_logits, input_ids, top_p, temperature, penalty,
                        top_k=TOP_K, min_tokens_to_keep=MIN_TOKENS_TO_KEEP):
    global _TWO_LEVEL_OK
    assert m_logits.ndim == 2 and m_logits.shape[0] == 1, "kernel assumes batch=1"
    assert input_ids.ndim == 2 and input_ids.shape[0] == 1
    V = m_logits.shape[1]
    S = input_ids.shape[1]
    assert V >= top_k and top_k <= _OUT_W

    # group size (sublane rows per group): bigger vocab -> bigger groups
    R0 = -(-V // _LANES)
    rpg = 8 if R0 <= 64 else (16 if R0 <= 256 else 32)
    blk = rpg * _LANES
    Vp = -(-V // blk) * blk
    R = Vp // _LANES
    G = R // rpg

    x = m_logits                                    # keep native dtype
    if Vp != V:                                     # -inf tail pad only if needed
        x = jnp.pad(x, ((0, 0), (0, Vp - V)), constant_values=-jnp.inf)
    x2 = x.reshape(R, _LANES)                       # sublane/lane-dense layout

    U = 8                                           # input_ids per hit-mask pass
    Sp = -(-S // U) * U
    ids = input_ids.reshape(-1).astype(jnp.int32)
    if Sp != S:
        ids = jnp.pad(ids, (0, Sp - S), constant_values=-1)   # -1 never matches

    def build(two_level):
        kern = functools.partial(_penalty_sample_kernel, top_k=top_k,
                                 min_keep=min_tokens_to_keep, rpg=rpg,
                                 n_id_steps=Sp // U, id_batch=U,
                                 two_level=two_level)
        return pl.pallas_call(
            kern,
            out_shape=(jax.ShapeDtypeStruct((1, _OUT_W), jnp.float32),
                       jax.ShapeDtypeStruct((1, _OUT_W), jnp.int32)),
            in_specs=[
                pl.BlockSpec(memory_space=pltpu.MemorySpace.VMEM),   # logits (R,128)
                pl.BlockSpec(memory_space=pltpu.MemorySpace.SMEM),   # input_ids (Sp,)
                pl.BlockSpec(memory_space=pltpu.MemorySpace.SMEM),   # top_p
                pl.BlockSpec(memory_space=pltpu.MemorySpace.SMEM),   # temperature
                pl.BlockSpec(memory_space=pltpu.MemorySpace.SMEM),   # penalty
            ],
            out_specs=(pl.BlockSpec(memory_space=pltpu.MemorySpace.VMEM),
                       pl.BlockSpec(memory_space=pltpu.MemorySpace.VMEM)),
            scratch_shapes=[pltpu.VMEM((R, _LANES), jnp.float32),    # work tile
                            pltpu.SMEM((1,), jnp.int32)],            # group idx
        )

    args = (x2, ids,
            jnp.asarray(top_p, jnp.float32).reshape(1),
            jnp.asarray(temperature, jnp.float32).reshape(1),
            jnp.asarray(penalty, jnp.float32).reshape(1))

    if _TWO_LEVEL_OK:
        try:
            probs, toks = build(two_level=True)(*args)
        except Exception:
            _TWO_LEVEL_OK = False
            probs, toks = build(two_level=False)(*args)
    else:
        probs, toks = build(two_level=False)(*args)

    # slice lane-dense (1,128) outputs back to (1, top_k)
    return probs[:, :top_k], toks[:, :top_k]


def _reference(m_logits, input_ids, top_p, temperature, penalty,
               top_k=TOP_K, min_keep=MIN_TOKENS_TO_KEEP):
    """Pure-JAX reference mirroring the PyTorch forward."""
    row = m_logits.astype(jnp.float32)
    gathered = jnp.take_along_axis(row, input_ids, axis=1)
    pen = jnp.where(gathered < 0, gathered * penalty, gathered / penalty)
    row = row.at[0, input_ids[0]].set(pen[0])
    vals, toks = lax.top_k(row, top_k)
    logits = vals / temperature
    probs = jax.nn.softmax(logits, axis=1)
    cum = jnp.cumsum(probs, axis=1)
    keep = jnp.zeros((1, top_k), bool).at[0, :min_keep].set(True)
    mask = (cum < top_p) | keep
    filtered = jnp.where(mask, logits, jnp.float32(-1000.0))
    return jax.nn.softmax(filtered, axis=1), toks


if __name__ == "__main__":
    key = jax.random.PRNGKey(0)
    top_p = jnp.float32(0.8)
    temperature = jnp.float32(1.2)
    penalty = jnp.float32(1.1)

    # (V, S): small single-group case and a multi-group case (G > 1) to
    # exercise the dynamic winning-group slicing of the two-level top-k.
    for (V, S) in ((512, 8), (2048, 12)):
        k1, k2, key = jax.random.split(key, 3)
        m_logits = jax.random.normal(k1, (1, V), dtype=jnp.float32) * 3.0
        input_ids = jax.random.randint(k2, (1, S), 0, V, dtype=jnp.int32)

        probs, tokens = penalty_sample_head(m_logits, input_ids, top_p,
                                            temperature, penalty)
        jax.block_until_ready((probs, tokens))

        ref_probs, ref_tokens = _reference(m_logits, input_ids, top_p,
                                           temperature, penalty)
        np.testing.assert_allclose(np.asarray(probs), np.asarray(ref_probs),
                                   rtol=1e-5, atol=1e-5)
        assert np.array_equal(np.asarray(tokens), np.asarray(ref_tokens))

    print("KERNEL_OK")
</pallas_src>

<mosaic_0001>
module attributes {stable_mosaic.version = 11 : i64} {
  func.func @_penalty_sample_kernel(%arg0: memref<8x128xf32, #tpu.memory_space<vmem>>, %arg1: memref<8xi32, #tpu.memory_space<smem>>, %arg2: memref<1xf32, #tpu.memory_space<smem>>, %arg3: memref<1xf32, #tpu.memory_space<smem>>, %arg4: memref<1xf32, #tpu.memory_space<smem>>, %arg5: memref<1x128xf32, #tpu.memory_space<vmem>>, %arg6: memref<1x128xi32, #tpu.memory_space<vmem>>, %arg7: memref<8x128xf32, #tpu.memory_space<vmem>>, %arg8: memref<1xi32, #tpu.memory_space<smem>>) attributes {dimension_semantics = [], scalar_prefetch = 0 : i64, scratch_operands = 2 : i64, tpu.core_type = #tpu.core_type<tc>} {
    %c0 = arith.constant 0 : index
    %0 = memref.load %arg4[%c0] : memref<1xf32, #tpu.memory_space<smem>>
    %cst = arith.constant 1.000000e+00 : f32
    %1 = arith.divf %cst, %0 : f32
    %c0_0 = arith.constant 0 : index
    %2 = memref.load %arg2[%c0_0] : memref<1xf32, #tpu.memory_space<smem>>
    %c0_1 = arith.constant 0 : index
    %3 = memref.load %arg3[%c0_1] : memref<1xf32, #tpu.memory_space<smem>>
    %4 = tpu.iota {dimensions = array<i32: 0>} : vector<8x128xi32>
    %c128_i32 = arith.constant 128 : i32
    %5 = vector.broadcast %c128_i32 : i32 to vector<8x128xi32>
    %6 = arith.muli %4, %5 : vector<8x128xi32>
    %7 = tpu.iota {dimensions = array<i32: 1>} : vector<8x128xi32>
    %8 = arith.addi %6, %7 : vector<8x128xi32>
    %c0_2 = arith.constant 0 : index
    %c0_3 = arith.constant 0 : index
    %9 = vector.load %arg0[%c0_2, %c0_3] : memref<8x128xf32, #tpu.memory_space<vmem>>, vector<8x128xf32>
    %c0_i32 = arith.constant 0 : i32
    %10 = vector.broadcast %c0_i32 : i32 to vector<8x128xi32>
    %11 = arith.addi %8, %10 : vector<8x128xi32>
    %c0_i32_4 = arith.constant 0 : i32
    %12 = vector.broadcast %c0_i32_4 : i32 to vector<8x128xi32>
    %c0_i32_5 = arith.constant 0 : i32
    %c8_i32 = arith.constant 8 : i32
    %13 = arith.muli %c0_i32_5, %c8_i32 : i32
    %c0_i32_6 = arith.constant 0 : i32
    %14 = arith.addi %13, %c0_i32_6 : i32
    %15 = arith.index_cast %14 : i32 to index
    %16 = memref.load %arg1[%15] : memref<8xi32, #tpu.memory_space<smem>>
    %17 = vector.broadcast %16 : i32 to vector<8x128xi32>
    %18 = arith.cmpi eq, %11, %17 : vector<8x128xi32>
    %c1_i32 = arith.constant 1 : i32
    %19 = vector.broadcast %c1_i32 : i32 to vector<8x128xi32>
    %20 = arith.select %18, %19, %12 : vector<8x128xi1>, vector<8x128xi32>
    %c8_i32_7 = arith.constant 8 : i32
    %21 = arith.muli %c0_i32_5, %c8_i32_7 : i32
    %c1_i32_8 = arith.constant 1 : i32
    %22 = arith.addi %21, %c1_i32_8 : i32
    %23 = arith.index_cast %22 : i32 to index
    %24 = memref.load %arg1[%23] : memref<8xi32, #tpu.memory_space<smem>>
    %25 = vector.broadcast %24 : i32 to vector<8x128xi32>
    %26 = arith.cmpi eq, %11, %25 : vector<8x128xi32>
    %c1_i32_9 = arith.constant 1 : i32
    %27 = vector.broadcast %c1_i32_9 : i32 to vector<8x128xi32>
    %28 = arith.select %26, %27, %20 : vector<8x128xi1>, vector<8x128xi32>
    %c8_i32_10 = arith.constant 8 : i32
    %29 = arith.muli %c0_i32_5, %c8_i32_10 : i32
    %c2_i32 = arith.constant 2 : i32
    %30 = arith.addi %29, %c2_i32 : i32
    %31 = arith.index_cast %30 : i32 to index
    %32 = memref.load %arg1[%31] : memref<8xi32, #tpu.memory_space<smem>>
    %33 = vector.broadcast %32 : i32 to vector<8x128xi32>
    %34 = arith.cmpi eq, %11, %33 : vector<8x128xi32>
    %c1_i32_11 = arith.constant 1 : i32
    %35 = vector.broadcast %c1_i32_11 : i32 to vector<8x128xi32>
    %36 = arith.select %34, %35, %28 : vector<8x128xi1>, vector<8x128xi32>
    %c8_i32_12 = arith.constant 8 : i32
    %37 = arith.muli %c0_i32_5, %c8_i32_12 : i32
    %c3_i32 = arith.constant 3 : i32
    %38 = arith.addi %37, %c3_i32 : i32
    %39 = arith.index_cast %38 : i32 to index
    %40 = memref.load %arg1[%39] : memref<8xi32, #tpu.memory_space<smem>>
    %41 = vector.broadcast %40 : i32 to vector<8x128xi32>
    %42 = arith.cmpi eq, %11, %41 : vector<8x128xi32>
    %c1_i32_13 = arith.constant 1 : i32
    %43 = vector.broadcast %c1_i32_13 : i32 to vector<8x128xi32>
    %44 = arith.select %42, %43, %36 : vector<8x128xi1>, vector<8x128xi32>
    %c8_i32_14 = arith.constant 8 : i32
    %45 = arith.muli %c0_i32_5, %c8_i32_14 : i32
    %c4_i32 = arith.constant 4 : i32
    %46 = arith.addi %45, %c4_i32 : i32
    %47 = arith.index_cast %46 : i32 to index
    %48 = memref.load %arg1[%47] : memref<8xi32, #tpu.memory_space<smem>>
    %49 = vector.broadcast %48 : i32 to vector<8x128xi32>
    %50 = arith.cmpi eq, %11, %49 : vector<8x128xi32>
    %c1_i32_15 = arith.constant 1 : i32
    %51 = vector.broadcast %c1_i32_15 : i32 to vector<8x128xi32>
    %52 = arith.select %50, %51, %44 : vector<8x128xi1>, vector<8x128xi32>
    %c8_i32_16 = arith.constant 8 : i32
    %53 = arith.muli %c0_i32_5, %c8_i32_16 : i32
    %c5_i32 = arith.constant 5 : i32
    %54 = arith.addi %53, %c5_i32 : i32
    %55 = arith.index_cast %54 : i32 to index
    %56 = memref.load %arg1[%55] : memref<8xi32, #tpu.memory_space<smem>>
    %57 = vector.broadcast %56 : i32 to vector<8x128xi32>
    %58 = arith.cmpi eq, %11, %57 : vector<8x128xi32>
    %c1_i32_17 = arith.constant 1 : i32
    %59 = vector.broadcast %c1_i32_17 : i32 to vector<8x128xi32>
    %60 = arith.select %58, %59, %52 : vector<8x128xi1>, vector<8x128xi32>
    %c8_i32_18 = arith.constant 8 : i32
    %61 = arith.muli %c0_i32_5, %c8_i32_18 : i32
    %c6_i32 = arith.constant 6 : i32
    %62 = arith.addi %61, %c6_i32 : i32
    %63 = arith.index_cast %62 : i32 to index
    %64 = memref.load %arg1[%63] : memref<8xi32, #tpu.memory_space<smem>>
    %65 = vector.broadcast %64 : i32 to vector<8x128xi32>
    %66 = arith.cmpi eq, %11, %65 : vector<8x128xi32>
    %c1_i32_19 = arith.constant 1 : i32
    %67 = vector.broadcast %c1_i32_19 : i32 to vector<8x128xi32>
    %68 = arith.select %66, %67, %60 : vector<8x128xi1>, vector<8x128xi32>
    %c8_i32_20 = arith.constant 8 : i32
    %69 = arith.muli %c0_i32_5, %c8_i32_20 : i32
    %c7_i32 = arith.constant 7 : i32
    %70 = arith.addi %69, %c7_i32 : i32
    %71 = arith.index_cast %70 : i32 to index
    %72 = memref.load %arg1[%71] : memref<8xi32, #tpu.memory_space<smem>>
    %73 = vector.broadcast %72 : i32 to vector<8x128xi32>
    %74 = arith.cmpi eq, %11, %73 : vector<8x128xi32>
    %c1_i32_21 = arith.constant 1 : i32
    %75 = vector.broadcast %c1_i32_21 : i32 to vector<8x128xi32>
    %76 = arith.select %74, %75, %68 : vector<8x128xi1>, vector<8x128xi32>
    %c1_i32_22 = arith.constant 1 : i32
    %cst_23 = arith.constant 0.000000e+00 : f32
    %77 = vector.broadcast %cst_23 : f32 to vector<8x128xf32>
    %78 = arith.cmpf olt, %9, %77 : vector<8x128xf32>
    %79 = vector.broadcast %0 : f32 to vector<8x128xf32>
    %80 = arith.mulf %9, %79 : vector<8x128xf32>
    %81 = vector.broadcast %1 : f32 to vector<8x128xf32>
    %82 = arith.mulf %9, %81 : vector<8x128xf32>
    %83 = arith.select %78, %80, %82 : vector<8x128xi1>, vector<8x128xf32>
    %c0_i32_24 = arith.constant 0 : i32
    %84 = vector.broadcast %c0_i32_24 : i32 to vector<8x128xi32>
    %85 = arith.cmpi sgt, %76, %84 : vector<8x128xi32>
    %86 = arith.select %85, %83, %9 : vector<8x128xi1>, vector<8x128xf32>
    %c0_25 = arith.constant 0 : index
    %c0_26 = arith.constant 0 : index
    %87 = vector.load %arg7[%c0_25, %c0_26] : memref<8x128xf32, #tpu.memory_space<vmem>>, vector<8x128xf32>
    tpu.vector_store %arg7[%c0_25, %c0_26], %86 {strides = array<i32>} : memref<8x128xf32, #tpu.memory_space<vmem>>, vector<8x128xf32>,
    %cst_27 = arith.constant dense<0xFF800000> : vector<128xf32>
    %88 = vector.multi_reduction <maximumf>, %86, %cst_27 [0] : vector<8x128xf32> to vector<128xf32>
    %89 = vector.shape_cast %88 : vector<128xf32> to vector<1x128xf32>
    %90 = tpu.iota {dimensions = array<i32: 1>} : vector<1x128xi32>
    %cst_28 = arith.constant 0xFF800000 : f32
    %91 = vector.broadcast %cst_28 : f32 to vector<1x128xf32>
    %c0_i32_29 = arith.constant 0 : i32
    %92 = vector.broadcast %c0_i32_29 : i32 to vector<1x128xi32>
    %93 = tpu.iota {dimensions = array<i32: 0>} : vector<1x128xi32>
    %cst_30 = arith.constant 0xFF800000 : f32
    %c0_i32_31 = arith.constant 0 : i32
    %c50_i32 = arith.constant 50 : i32
    %94 = arith.addi %c0_i32_31, %c50_i32 : i32
    %c1_i32_32 = arith.constant 1 : i32
    %95:3 = scf.for %arg9 = %c0_i32_31 to %94 step %c1_i32_32 iter_args(%arg10 = %89, %arg11 = %91, %arg12 = %92) -> (vector<1x128xf32>, vector<1x128xf32>, vector<1x128xi32>)  : i32 {
      %171 = vector.shape_cast %arg10 : vector<1x128xf32> to vector<1x1x128xf32>
      %cst_64 = arith.constant dense<0xFF800000> : vector<1xf32>
      %172 = vector.multi_reduction <maximumf>, %171, %cst_64 [1, 2] : vector<1x1x128xf32> to vector<1xf32>
      %173 = vector.shape_cast %172 : vector<1xf32> to vector<1x1x1xf32>
      %174 = vector.extract %173[0, 0, 0] : f32 from vector<1x1x1xf32>
      %175 = vector.broadcast %174 : f32 to vector<1x128xf32>
      %176 = arith.cmpf oeq, %arg10, %175 : vector<1x128xf32>
      %c1_i32_65 = arith.constant 1 : i32
      %177 = vector.broadcast %c1_i32_65 : i32 to vector<1x128xi32>
      %178 = arith.select %176, %93, %177 : vector<1x128xi1>, vector<1x128xi32>
      %179 = vector.shape_cast %178 : vector<1x128xi32> to vector<1x1x128xi32>
      %cst_66 = arith.constant dense<2147483647> : vector<1xi32>
      %180 = vector.multi_reduction <minsi>, %179, %cst_66 [1, 2] : vector<1x1x128xi32> to vector<1xi32>
      %181 = vector.shape_cast %180 : vector<1xi32> to vector<1x1x1xi32>
      %182 = vector.extract %181[0, 0, 0] : i32 from vector<1x1x1xi32>
      %c0_i32_67 = arith.constant 0 : i32
      %183 = arith.minsi %182, %c0_i32_67 : i32
      %c0_68 = arith.constant 0 : index
      %184 = memref.load %arg8[%c0_68] : memref<1xi32, #tpu.memory_space<smem>>
      memref.store %183, %arg8[%c0_68] : memref<1xi32, #tpu.memory_space<smem>>
      %c0_69 = arith.constant 0 : index
      %185 = memref.load %arg8[%c0_69] : memref<1xi32, #tpu.memory_space<smem>>
      %c8_i32_70 = arith.constant 8 : i32
      %186 = arith.muli %185, %c8_i32_70 : i32
      %187 = tpu.assume_multiple %186, 8 : i32
      %188 = arith.index_cast %187 : i32 to index
      %c0_71 = arith.constant 0 : index
      %189 = vector.load %arg7[%188, %c0_71] : memref<8x128xf32, #tpu.memory_space<vmem>>, vector<8x128xf32>
      %190 = vector.broadcast %174 : f32 to vector<8x128xf32>
      %191 = arith.cmpf oeq, %189, %190 : vector<8x128xf32>
      %c1024_i32 = arith.constant 1024 : i32
      %192 = vector.broadcast %c1024_i32 : i32 to vector<8x128xi32>
      %193 = arith.select %191, %8, %192 : vector<8x128xi1>, vector<8x128xi32>
      %194 = vector.shape_cast %193 : vector<8x128xi32> to vector<1x8x128xi32>
      %cst_72 = arith.constant dense<2147483647> : vector<1xi32>
      %195 = vector.multi_reduction <minsi>, %194, %cst_72 [1, 2] : vector<1x8x128xi32> to vector<1xi32>
      %196 = vector.shape_cast %195 : vector<1xi32> to vector<1x1x1xi32>
      %197 = vector.extract %196[0, 0, 0] : i32 from vector<1x1x1xi32>
      %198 = vector.broadcast %197 : i32 to vector<8x128xi32>
      %199 = arith.cmpi eq, %8, %198 : vector<8x128xi32>
      %200 = vector.broadcast %cst_30 : f32 to vector<8x128xf32>
      %201 = arith.select %199, %200, %189 : vector<8x128xi1>, vector<8x128xf32>
      %202 = arith.index_cast %187 : i32 to index
      %c0_73 = arith.constant 0 : index
      %203 = vector.load %arg7[%202, %c0_73] : memref<8x128xf32, #tpu.memory_space<vmem>>, vector<8x128xf32>
      tpu.vector_store %arg7[%202, %c0_73], %201 {strides = array<i32>} : memref<8x128xf32, #tpu.memory_space<vmem>>, vector<8x128xf32>,
      %cst_74 = arith.constant dense<0xFF800000> : vector<128xf32>
      %204 = vector.multi_reduction <maximumf>, %201, %cst_74 [0] : vector<8x128xf32> to vector<128xf32>
      %205 = vector.shape_cast %204 : vector<128xf32> to vector<1x128xf32>
      %206 = vector.broadcast %185 : i32 to vector<1x128xi32>
      %207 = arith.cmpi eq, %93, %206 : vector<1x128xi32>
      %208 = arith.select %207, %205, %arg10 : vector<1x128xi1>, vector<1x128xf32>
      %c128_i32_75 = arith.constant 128 : i32
      %209 = arith.muli %187, %c128_i32_75 : i32
      %210 = arith.addi %197, %209 : i32
      %211 = vector.broadcast %arg9 : i32 to vector<1x128xi32>
      %212 = arith.cmpi eq, %90, %211 : vector<1x128xi32>
      %213 = vector.broadcast %174 : f32 to vector<1x128xf32>
      %214 = arith.select %212, %213, %arg11 : vector<1x128xi1>, vector<1x128xf32>
      %215 = vector.broadcast %arg9 : i32 to vector<1x128xi32>
      %216 = arith.cmpi eq, %90, %215 : vector<1x128xi32>
      %217 = vector.broadcast %210 : i32 to vector<1x128xi32>
      %218 = arith.select %216, %217, %arg12 : vector<1x128xi1>, vector<1x128xi32>
      scf.yield %208, %214, %218 : vector<1x128xf32>, vector<1x128xf32>, vector<1x128xi32>
    }
    %c50_i32_33 = arith.constant 50 : i32
    %96 = vector.broadcast %3 : f32 to vector<1x128xf32>
    %97 = arith.divf %95#1, %96 : vector<1x128xf32>
    %cst_34 = arith.constant dense<0xFF800000> : vector<1xf32>
    %98 = vector.multi_reduction <maximumf>, %97, %cst_34 [1] : vector<1x128xf32> to vector<1xf32>
    %99 = vector.shape_cast %98 : vector<1xf32> to vector<1x1xf32>
    %100 = vector.broadcast %99 : vector<1x1xf32> to vector<1x128xf32>
    %101 = arith.subf %97, %100 : vector<1x128xf32>
    %102 = math.exp %101 : vector<1x128xf32>
    %cst_35 = arith.constant dense<0.000000e+00> : vector<1xf32>
    %103 = vector.multi_reduction <add>, %102, %cst_35 [1] : vector<1x128xf32> to vector<1xf32>
    %104 = vector.shape_cast %103 : vector<1xf32> to vector<1x1xf32>
    %105 = vector.broadcast %104 : vector<1x1xf32> to vector<1x128xf32>
    %106 = arith.divf %102, %105 : vector<1x128xf32>
    %c1_i32_36 = arith.constant 1 : i32
    %107 = tpu.dynamic_rotate %106 by %c1_i32_36 dim 1 : vector<1x128xf32>, i32 -> vector<1x128xf32>
    %c1_i32_37 = arith.constant 1 : i32
    %108 = vector.broadcast %c1_i32_37 : i32 to vector<1x128xi32>
    %109 = arith.cmpi sge, %90, %108 : vector<1x128xi32>
    %cst_38 = arith.constant 0.000000e+00 : f32
    %110 = vector.broadcast %cst_38 : f32 to vector<1x128xf32>
    %111 = arith.select %109, %107, %110 : vector<1x128xi1>, vector<1x128xf32>
    %112 = arith.addf %106, %111 : vector<1x128xf32>
    %c2_i32_39 = arith.constant 2 : i32
    %113 = tpu.dynamic_rotate %112 by %c2_i32_39 dim 1 : vector<1x128xf32>, i32 -> vector<1x128xf32>
    %c2_i32_40 = arith.constant 2 : i32
    %114 = vector.broadcast %c2_i32_40 : i32 to vector<1x128xi32>
    %115 = arith.cmpi sge, %90, %114 : vector<1x128xi32>
    %cst_41 = arith.constant 0.000000e+00 : f32
    %116 = vector.broadcast %cst_41 : f32 to vector<1x128xf32>
    %117 = arith.select %115, %113, %116 : vector<1x128xi1>, vector<1x128xf32>
    %118 = arith.addf %112, %117 : vector<1x128xf32>
    %c4_i32_42 = arith.constant 4 : i32
    %119 = tpu.dynamic_rotate %118 by %c4_i32_42 dim 1 : vector<1x128xf32>, i32 -> vector<1x128xf32>
    %c4_i32_43 = arith.constant 4 : i32
    %120 = vector.broadcast %c4_i32_43 : i32 to vector<1x128xi32>
    %121 = arith.cmpi sge, %90, %120 : vector<1x128xi32>
    %cst_44 = arith.constant 0.000000e+00 : f32
    %122 = vector.broadcast %cst_44 : f32 to vector<1x128xf32>
    %123 = arith.select %121, %119, %122 : vector<1x128xi1>, vector<1x128xf32>
    %124 = arith.addf %118, %123 : vector<1x128xf32>
    %c8_i32_45 = arith.constant 8 : i32
    %125 = tpu.dynamic_rotate %124 by %c8_i32_45 dim 1 : vector<1x128xf32>, i32 -> vector<1x128xf32>
    %c8_i32_46 = arith.constant 8 : i32
    %126 = vector.broadcast %c8_i32_46 : i32 to vector<1x128xi32>
    %127 = arith.cmpi sge, %90, %126 : vector<1x128xi32>
    %cst_47 = arith.constant 0.000000e+00 : f32
    %128 = vector.broadcast %cst_47 : f32 to vector<1x128xf32>
    %129 = arith.select %127, %125, %128 : vector<1x128xi1>, vector<1x128xf32>
    %130 = arith.addf %124, %129 : vector<1x128xf32>
    %c16_i32 = arith.constant 16 : i32
    %131 = tpu.dynamic_rotate %130 by %c16_i32 dim 1 : vector<1x128xf32>, i32 -> vector<1x128xf32>
    %c16_i32_48 = arith.constant 16 : i32
    %132 = vector.broadcast %c16_i32_48 : i32 to vector<1x128xi32>
    %133 = arith.cmpi sge, %90, %132 : vector<1x128xi32>
    %cst_49 = arith.constant 0.000000e+00 : f32
    %134 = vector.broadcast %cst_49 : f32 to vector<1x128xf32>
    %135 = arith.select %133, %131, %134 : vector<1x128xi1>, vector<1x128xf32>
    %136 = arith.addf %130, %135 : vector<1x128xf32>
    %c32_i32 = arith.constant 32 : i32
    %137 = tpu.dynamic_rotate %136 by %c32_i32 dim 1 : vector<1x128xf32>, i32 -> vector<1x128xf32>
    %c32_i32_50 = arith.constant 32 : i32
    %138 = vector.broadcast %c32_i32_50 : i32 to vector<1x128xi32>
    %139 = arith.cmpi sge, %90, %138 : vector<1x128xi32>
    %cst_51 = arith.constant 0.000000e+00 : f32
    %140 = vector.broadcast %cst_51 : f32 to vector<1x128xf32>
    %141 = arith.select %139, %137, %140 : vector<1x128xi1>, vector<1x128xf32>
    %142 = arith.addf %136, %141 : vector<1x128xf32>
    %c64_i32 = arith.constant 64 : i32
    %143 = tpu.dynamic_rotate %142 by %c64_i32 dim 1 : vector<1x128xf32>, i32 -> vector<1x128xf32>
    %c64_i32_52 = arith.constant 64 : i32
    %144 = vector.broadcast %c64_i32_52 : i32 to vector<1x128xi32>
    %145 = arith.cmpi sge, %90, %144 : vector<1x128xi32>
    %cst_53 = arith.constant 0.000000e+00 : f32
    %146 = vector.broadcast %cst_53 : f32 to vector<1x128xf32>
    %147 = arith.select %145, %143, %146 : vector<1x128xi1>, vector<1x128xf32>
    %148 = arith.addf %142, %147 : vector<1x128xf32>
    %149 = vector.broadcast %2 : f32 to vector<1x128xf32>
    %150 = arith.cmpf olt, %148, %149 : vector<1x128xf32>
    %c5_i32_54 = arith.constant 5 : i32
    %151 = vector.broadcast %c5_i32_54 : i32 to vector<1x128xi32>
    %152 = arith.cmpi slt, %90, %151 : vector<1x128xi32>
    %153 = arith.ori %150, %152 : vector<1x128xi1>
    %cst_55 = arith.constant -1.000000e+03 : f32
    %154 = vector.broadcast %cst_55 : f32 to vector<1x128xf32>
    %155 = arith.select %153, %97, %154 : vector<1x128xi1>, vector<1x128xf32>
    %c50_i32_56 = arith.constant 50 : i32
    %156 = vector.broadcast %c50_i32_56 : i32 to vector<1x128xi32>
    %157 = arith.cmpi slt, %90, %156 : vector<1x128xi32>
    %cst_57 = arith.constant 0xFF800000 : f32
    %158 = vector.broadcast %cst_57 : f32 to vector<1x128xf32>
    %159 = arith.select %157, %155, %158 : vector<1x128xi1>, vector<1x128xf32>
    %cst_58 = arith.constant dense<0xFF800000> : vector<1xf32>
    %160 = vector.multi_reduction <maximumf>, %159, %cst_58 [1] : vector<1x128xf32> to vector<1xf32>
    %161 = vector.shape_cast %160 : vector<1xf32> to vector<1x1xf32>
    %162 = vector.broadcast %161 : vector<1x1xf32> to vector<1x128xf32>
    %163 = arith.subf %159, %162 : vector<1x128xf32>
    %164 = math.exp %163 : vector<1x128xf32>
    %cst_59 = arith.constant dense<0.000000e+00> : vector<1xf32>
    %165 = vector.multi_reduction <add>, %164, %cst_59 [1] : vector<1x128xf32> to vector<1xf32>
    %166 = vector.shape_cast %165 : vector<1xf32> to vector<1x1xf32>
    %167 = vector.broadcast %166 : vector<1x1xf32> to vector<1x128xf32>
    %168 = arith.divf %164, %167 : vector<1x128xf32>
    %c0_60 = arith.constant 0 : index
    %c0_61 = arith.constant 0 : index
    %169 = vector.load %arg5[%c0_60, %c0_61] : memref<1x128xf32, #tpu.memory_space<vmem>>, vector<1x128xf32>
    tpu.vector_store %arg5[%c0_60, %c0_61], %168 {strides = array<i32>} : memref<1x128xf32, #tpu.memory_space<vmem>>, vector<1x128xf32>,
    %c0_62 = arith.constant 0 : index
    %c0_63 = arith.constant 0 : index
    %170 = vector.load %arg6[%c0_62, %c0_63] : memref<1x128xi32, #tpu.memory_space<vmem>>, vector<1x128xi32>
    tpu.vector_store %arg6[%c0_62, %c0_63], %95#2 {strides = array<i32>} : memref<1x128xi32, #tpu.memory_space<vmem>>, vector<1x128xi32>,
    return
  }
}

module attributes {stable_mosaic.version = 11 : i64} {
  func.func @_penalty_sample_kernel(%arg0: memref<8x128xf32, #tpu.memory_space<vmem>>, %arg1: memref<8xi32, #tpu.memory_space<smem>>, %arg2: memref<1xf32, #tpu.memory_space<smem>>, %arg3: memref<1xf32, #tpu.memory_space<smem>>, %arg4: memref<1xf32, #tpu.memory_space<smem>>, %arg5: memref<1x128xf32, #tpu.memory_space<vmem>>, %arg6: memref<1x128xi32, #tpu.memory_space<vmem>>, %arg7: memref<8x128xf32, #tpu.memory_space<vmem>>, %arg8: memref<1xi32, #tpu.memory_space<smem>>) attributes {dimension_semantics = [], scalar_prefetch = 0 : i64, scratch_operands = 2 : i64, tpu.core_type = #tpu.core_type<tc>} {
    %c0 = arith.constant 0 : index
    %0 = memref.load %arg4[%c0] : memref<1xf32, #tpu.memory_space<smem>>
    %cst = arith.constant 1.000000e+00 : f32
    %1 = arith.divf %cst, %0 : f32
    %c0_0 = arith.constant 0 : index
    %2 = memref.load %arg2[%c0_0] : memref<1xf32, #tpu.memory_space<smem>>
    %c0_1 = arith.constant 0 : index
    %3 = memref.load %arg3[%c0_1] : memref<1xf32, #tpu.memory_space<smem>>
    %4 = tpu.iota {dimensions = array<i32: 0>} : vector<8x128xi32>
    %c128_i32 = arith.constant 128 : i32
    %5 = vector.broadcast %c128_i32 : i32 to vector<8x128xi32>
    %6 = arith.muli %4, %5 : vector<8x128xi32>
    %7 = tpu.iota {dimensions = array<i32: 1>} : vector<8x128xi32>
    %8 = arith.addi %6, %7 : vector<8x128xi32>
    %c0_2 = arith.constant 0 : index
    %c0_3 = arith.constant 0 : index
    %9 = vector.load %arg0[%c0_2, %c0_3] : memref<8x128xf32, #tpu.memory_space<vmem>>, vector<8x128xf32>
    %c0_i32 = arith.constant 0 : i32
    %10 = vector.broadcast %c0_i32 : i32 to vector<8x128xi32>
    %11 = arith.addi %8, %10 : vector<8x128xi32>
    %c0_i32_4 = arith.constant 0 : i32
    %12 = vector.broadcast %c0_i32_4 : i32 to vector<8x128xi32>
    %c0_i32_5 = arith.constant 0 : i32
    %c8_i32 = arith.constant 8 : i32
    %13 = arith.muli %c0_i32_5, %c8_i32 : i32
    %c0_i32_6 = arith.constant 0 : i32
    %14 = arith.addi %13, %c0_i32_6 : i32
    %15 = arith.index_cast %14 : i32 to index
    %16 = memref.load %arg1[%15] : memref<8xi32, #tpu.memory_space<smem>>
    %17 = vector.broadcast %16 : i32 to vector<8x128xi32>
    %18 = arith.cmpi eq, %11, %17 : vector<8x128xi32>
    %c1_i32 = arith.constant 1 : i32
    %19 = vector.broadcast %c1_i32 : i32 to vector<8x128xi32>
    %20 = arith.select %18, %19, %12 : vector<8x128xi1>, vector<8x128xi32>
    %c8_i32_7 = arith.constant 8 : i32
    %21 = arith.muli %c0_i32_5, %c8_i32_7 : i32
    %c1_i32_8 = arith.constant 1 : i32
    %22 = arith.addi %21, %c1_i32_8 : i32
    %23 = arith.index_cast %22 : i32 to index
    %24 = memref.load %arg1[%23] : memref<8xi32, #tpu.memory_space<smem>>
    %25 = vector.broadcast %24 : i32 to vector<8x128xi32>
    %26 = arith.cmpi eq, %11, %25 : vector<8x128xi32>
    %c1_i32_9 = arith.constant 1 : i32
    %27 = vector.broadcast %c1_i32_9 : i32 to vector<8x128xi32>
    %28 = arith.select %26, %27, %20 : vector<8x128xi1>, vector<8x128xi32>
    %c8_i32_10 = arith.constant 8 : i32
    %29 = arith.muli %c0_i32_5, %c8_i32_10 : i32
    %c2_i32 = arith.constant 2 : i32
    %30 = arith.addi %29, %c2_i32 : i32
    %31 = arith.index_cast %30 : i32 to index
    %32 = memref.load %arg1[%31] : memref<8xi32, #tpu.memory_space<smem>>
    %33 = vector.broadcast %32 : i32 to vector<8x128xi32>
    %34 = arith.cmpi eq, %11, %33 : vector<8x128xi32>
    %c1_i32_11 = arith.constant 1 : i32
    %35 = vector.broadcast %c1_i32_11 : i32 to vector<8x128xi32>
    %36 = arith.select %34, %35, %28 : vector<8x128xi1>, vector<8x128xi32>
    %c8_i32_12 = arith.constant 8 : i32
    %37 = arith.muli %c0_i32_5, %c8_i32_12 : i32
    %c3_i32 = arith.constant 3 : i32
    %38 = arith.addi %37, %c3_i32 : i32
    %39 = arith.index_cast %38 : i32 to index
    %40 = memref.load %arg1[%39] : memref<8xi32, #tpu.memory_space<smem>>
    %41 = vector.broadcast %40 : i32 to vector<8x128xi32>
    %42 = arith.cmpi eq, %11, %41 : vector<8x128xi32>
    %c1_i32_13 = arith.constant 1 : i32
    %43 = vector.broadcast %c1_i32_13 : i32 to vector<8x128xi32>
    %44 = arith.select %42, %43, %36 : vector<8x128xi1>, vector<8x128xi32>
    %c8_i32_14 = arith.constant 8 : i32
    %45 = arith.muli %c0_i32_5, %c8_i32_14 : i32
    %c4_i32 = arith.constant 4 : i32
    %46 = arith.addi %45, %c4_i32 : i32
    %47 = arith.index_cast %46 : i32 to index
    %48 = memref.load %arg1[%47] : memref<8xi32, #tpu.memory_space<smem>>
    %49 = vector.broadcast %48 : i32 to vector<8x128xi32>
    %50 = arith.cmpi eq, %11, %49 : vector<8x128xi32>
    %c1_i32_15 = arith.constant 1 : i32
    %51 = vector.broadcast %c1_i32_15 : i32 to vector<8x128xi32>
    %52 = arith.select %50, %51, %44 : vector<8x128xi1>, vector<8x128xi32>
    %c8_i32_16 = arith.constant 8 : i32
    %53 = arith.muli %c0_i32_5, %c8_i32_16 : i32
    %c5_i32 = arith.constant 5 : i32
    %54 = arith.addi %53, %c5_i32 : i32
    %55 = arith.index_cast %54 : i32 to index
    %56 = memref.load %arg1[%55] : memref<8xi32, #tpu.memory_space<smem>>
    %57 = vector.broadcast %56 : i32 to vector<8x128xi32>
    %58 = arith.cmpi eq, %11, %57 : vector<8x128xi32>
    %c1_i32_17 = arith.constant 1 : i32
    %59 = vector.broadcast %c1_i32_17 : i32 to vector<8x128xi32>
    %60 = arith.select %58, %59, %52 : vector<8x128xi1>, vector<8x128xi32>
    %c8_i32_18 = arith.constant 8 : i32
    %61 = arith.muli %c0_i32_5, %c8_i32_18 : i32
    %c6_i32 = arith.constant 6 : i32
    %62 = arith.addi %61, %c6_i32 : i32
    %63 = arith.index_cast %62 : i32 to index
    %64 = memref.load %arg1[%63] : memref<8xi32, #tpu.memory_space<smem>>
    %65 = vector.broadcast %64 : i32 to vector<8x128xi32>
    %66 = arith.cmpi eq, %11, %65 : vector<8x128xi32>
    %c1_i32_19 = arith.constant 1 : i32
    %67 = vector.broadcast %c1_i32_19 : i32 to vector<8x128xi32>
    %68 = arith.select %66, %67, %60 : vector<8x128xi1>, vector<8x128xi32>
    %c8_i32_20 = arith.constant 8 : i32
    %69 = arith.muli %c0_i32_5, %c8_i32_20 : i32
    %c7_i32 = arith.constant 7 : i32
    %70 = arith.addi %69, %c7_i32 : i32
    %71 = arith.index_cast %70 : i32 to index
    %72 = memref.load %arg1[%71] : memref<8xi32, #tpu.memory_space<smem>>
    %73 = vector.broadcast %72 : i32 to vector<8x128xi32>
    %74 = arith.cmpi eq, %11, %73 : vector<8x128xi32>
    %c1_i32_21 = arith.constant 1 : i32
    %75 = vector.broadcast %c1_i32_21 : i32 to vector<8x128xi32>
    %76 = arith.select %74, %75, %68 : vector<8x128xi1>, vector<8x128xi32>
    %c1_i32_22 = arith.constant 1 : i32
    %cst_23 = arith.constant 0.000000e+00 : f32
    %77 = vector.broadcast %cst_23 : f32 to vector<8x128xf32>
    %78 = arith.cmpf olt, %9, %77 : vector<8x128xf32>
    %79 = vector.broadcast %0 : f32 to vector<8x128xf32>
    %80 = arith.mulf %9, %79 : vector<8x128xf32>
    %81 = vector.broadcast %1 : f32 to vector<8x128xf32>
    %82 = arith.mulf %9, %81 : vector<8x128xf32>
    %83 = arith.select %78, %80, %82 : vector<8x128xi1>, vector<8x128xf32>
    %c0_i32_24 = arith.constant 0 : i32
    %84 = vector.broadcast %c0_i32_24 : i32 to vector<8x128xi32>
    %85 = arith.cmpi sgt, %76, %84 : vector<8x128xi32>
    %86 = arith.select %85, %83, %9 : vector<8x128xi1>, vector<8x128xf32>
    %c0_25 = arith.constant 0 : index
    %c0_26 = arith.constant 0 : index
    %87 = vector.load %arg7[%c0_25, %c0_26] : memref<8x128xf32, #tpu.memory_space<vmem>>, vector<8x128xf32>
    tpu.vector_store %arg7[%c0_25, %c0_26], %86 {strides = array<i32>} : memref<8x128xf32, #tpu.memory_space<vmem>>, vector<8x128xf32>,
    %88 = tpu.iota {dimensions = array<i32: 1>} : vector<1x128xi32>
    %cst_27 = arith.constant 0xFF800000 : f32
    %89 = vector.broadcast %cst_27 : f32 to vector<1x128xf32>
    %c0_i32_28 = arith.constant 0 : i32
    %90 = vector.broadcast %c0_i32_28 : i32 to vector<1x128xi32>
    %91 = tpu.iota {dimensions = array<i32: 0>} : vector<8x128xi32>
    %c128_i32_29 = arith.constant 128 : i32
    %92 = vector.broadcast %c128_i32_29 : i32 to vector<8x128xi32>
    %93 = arith.muli %91, %92 : vector<8x128xi32>
    %94 = tpu.iota {dimensions = array<i32: 1>} : vector<8x128xi32>
    %95 = arith.addi %93, %94 : vector<8x128xi32>
    %c0_30 = arith.constant 0 : index
    %c0_31 = arith.constant 0 : index
    %96 = vector.load %arg7[%c0_30, %c0_31] : memref<8x128xf32, #tpu.memory_space<vmem>>, vector<8x128xf32>
    %cst_32 = arith.constant 0xFF800000 : f32
    %c0_i32_33 = arith.constant 0 : i32
    %c50_i32 = arith.constant 50 : i32
    %97 = arith.addi %c0_i32_33, %c50_i32 : i32
    %c1_i32_34 = arith.constant 1 : i32
    %98:3 = scf.for %arg9 = %c0_i32_33 to %97 step %c1_i32_34 iter_args(%arg10 = %96, %arg11 = %89, %arg12 = %90) -> (vector<8x128xf32>, vector<1x128xf32>, vector<1x128xi32>)  : i32 {
      %174 = vector.shape_cast %arg10 : vector<8x128xf32> to vector<1x8x128xf32>
      %cst_66 = arith.constant dense<0xFF800000> : vector<1xf32>
      %175 = vector.multi_reduction <maximumf>, %174, %cst_66 [1, 2] : vector<1x8x128xf32> to vector<1xf32>
      %176 = vector.shape_cast %175 : vector<1xf32> to vector<1x1x1xf32>
      %177 = vector.extract %176[0, 0, 0] : f32 from vector<1x1x1xf32>
      %178 = vector.broadcast %177 : f32 to vector<8x128xf32>
      %179 = arith.cmpf oeq, %arg10, %178 : vector<8x128xf32>
      %c1024_i32 = arith.constant 1024 : i32
      %180 = vector.broadcast %c1024_i32 : i32 to vector<8x128xi32>
      %181 = arith.select %179, %95, %180 : vector<8x128xi1>, vector<8x128xi32>
      %182 = vector.shape_cast %181 : vector<8x128xi32> to vector<1x8x128xi32>
      %cst_67 = arith.constant dense<2147483647> : vector<1xi32>
      %183 = vector.multi_reduction <minsi>, %182, %cst_67 [1, 2] : vector<1x8x128xi32> to vector<1xi32>
      %184 = vector.shape_cast %183 : vector<1xi32> to vector<1x1x1xi32>
      %185 = vector.extract %184[0, 0, 0] : i32 from vector<1x1x1xi32>
      %186 = vector.broadcast %arg9 : i32 to vector<1x128xi32>
      %187 = arith.cmpi eq, %88, %186 : vector<1x128xi32>
      %188 = vector.broadcast %177 : f32 to vector<1x128xf32>
      %189 = arith.select %187, %188, %arg11 : vector<1x128xi1>, vector<1x128xf32>
      %190 = vector.broadcast %arg9 : i32 to vector<1x128xi32>
      %191 = arith.cmpi eq, %88, %190 : vector<1x128xi32>
      %192 = vector.broadcast %185 : i32 to vector<1x128xi32>
      %193 = arith.select %191, %192, %arg12 : vector<1x128xi1>, vector<1x128xi32>
      %194 = vector.broadcast %185 : i32 to vector<8x128xi32>
      %195 = arith.cmpi eq, %95, %194 : vector<8x128xi32>
      %196 = vector.broadcast %cst_32 : f32 to vector<8x128xf32>
      %197 = arith.select %195, %196, %arg10 : vector<8x128xi1>, vector<8x128xf32>
      scf.yield %197, %189, %193 : vector<8x128xf32>, vector<1x128xf32>, vector<1x128xi32>
    }
    %c50_i32_35 = arith.constant 50 : i32
    %99 = vector.broadcast %3 : f32 to vector<1x128xf32>
    %100 = arith.divf %98#1, %99 : vector<1x128xf32>
    %cst_36 = arith.constant dense<0xFF800000> : vector<1xf32>
    %101 = vector.multi_reduction <maximumf>, %100, %cst_36 [1] : vector<1x128xf32> to vector<1xf32>
    %102 = vector.shape_cast %101 : vector<1xf32> to vector<1x1xf32>
    %103 = vector.broadcast %102 : vector<1x1xf32> to vector<1x128xf32>
    %104 = arith.subf %100, %103 : vector<1x128xf32>
    %105 = math.exp %104 : vector<1x128xf32>
    %cst_37 = arith.constant dense<0.000000e+00> : vector<1xf32>
    %106 = vector.multi_reduction <add>, %105, %cst_37 [1] : vector<1x128xf32> to vector<1xf32>
    %107 = vector.shape_cast %106 : vector<1xf32> to vector<1x1xf32>
    %108 = vector.broadcast %107 : vector<1x1xf32> to vector<1x128xf32>
    %109 = arith.divf %105, %108 : vector<1x128xf32>
    %c1_i32_38 = arith.constant 1 : i32
    %110 = tpu.dynamic_rotate %109 by %c1_i32_38 dim 1 : vector<1x128xf32>, i32 -> vector<1x128xf32>
    %c1_i32_39 = arith.constant 1 : i32
    %111 = vector.broadcast %c1_i32_39 : i32 to vector<1x128xi32>
    %112 = arith.cmpi sge, %88, %111 : vector<1x128xi32>
    %cst_40 = arith.constant 0.000000e+00 : f32
    %113 = vector.broadcast %cst_40 : f32 to vector<1x128xf32>
    %114 = arith.select %112, %110, %113 : vector<1x128xi1>, vector<1x128xf32>
    %115 = arith.addf %109, %114 : vector<1x128xf32>
    %c2_i32_41 = arith.constant 2 : i32
    %116 = tpu.dynamic_rotate %115 by %c2_i32_41 dim 1 : vector<1x128xf32>, i32 -> vector<1x128xf32>
    %c2_i32_42 = arith.constant 2 : i32
    %117 = vector.broadcast %c2_i32_42 : i32 to vector<1x128xi32>
    %118 = arith.cmpi sge, %88, %117 : vector<1x128xi32>
    %cst_43 = arith.constant 0.000000e+00 : f32
    %119 = vector.broadcast %cst_43 : f32 to vector<1x128xf32>
    %120 = arith.select %118, %116, %119 : vector<1x128xi1>, vector<1x128xf32>
    %121 = arith.addf %115, %120 : vector<1x128xf32>
    %c4_i32_44 = arith.constant 4 : i32
    %122 = tpu.dynamic_rotate %121 by %c4_i32_44 dim 1 : vector<1x128xf32>, i32 -> vector<1x128xf32>
    %c4_i32_45 = arith.constant 4 : i32
    %123 = vector.broadcast %c4_i32_45 : i32 to vector<1x128xi32>
    %124 = arith.cmpi sge, %88, %123 : vector<1x128xi32>
    %cst_46 = arith.constant 0.000000e+00 : f32
    %125 = vector.broadcast %cst_46 : f32 to vector<1x128xf32>
    %126 = arith.select %124, %122, %125 : vector<1x128xi1>, vector<1x128xf32>
    %127 = arith.addf %121, %126 : vector<1x128xf32>
    %c8_i32_47 = arith.constant 8 : i32
    %128 = tpu.dynamic_rotate %127 by %c8_i32_47 dim 1 : vector<1x128xf32>, i32 -> vector<1x128xf32>
    %c8_i32_48 = arith.constant 8 : i32
    %129 = vector.broadcast %c8_i32_48 : i32 to vector<1x128xi32>
    %130 = arith.cmpi sge, %88, %129 : vector<1x128xi32>
    %cst_49 = arith.constant 0.000000e+00 : f32
    %131 = vector.broadcast %cst_49 : f32 to vector<1x128xf32>
    %132 = arith.select %130, %128, %131 : vector<1x128xi1>, vector<1x128xf32>
    %133 = arith.addf %127, %132 : vector<1x128xf32>
    %c16_i32 = arith.constant 16 : i32
    %134 = tpu.dynamic_rotate %133 by %c16_i32 dim 1 : vector<1x128xf32>, i32 -> vector<1x128xf32>
    %c16_i32_50 = arith.constant 16 : i32
    %135 = vector.broadcast %c16_i32_50 : i32 to vector<1x128xi32>
    %136 = arith.cmpi sge, %88, %135 : vector<1x128xi32>
    %cst_51 = arith.constant 0.000000e+00 : f32
    %137 = vector.broadcast %cst_51 : f32 to vector<1x128xf32>
    %138 = arith.select %136, %134, %137 : vector<1x128xi1>, vector<1x128xf32>
    %139 = arith.addf %133, %138 : vector<1x128xf32>
    %c32_i32 = arith.constant 32 : i32
    %140 = tpu.dynamic_rotate %139 by %c32_i32 dim 1 : vector<1x128xf32>, i32 -> vector<1x128xf32>
    %c32_i32_52 = arith.constant 32 : i32
    %141 = vector.broadcast %c32_i32_52 : i32 to vector<1x128xi32>
    %142 = arith.cmpi sge, %88, %141 : vector<1x128xi32>
    %cst_53 = arith.constant 0.000000e+00 : f32
    %143 = vector.broadcast %cst_53 : f32 to vector<1x128xf32>
    %144 = arith.select %142, %140, %143 : vector<1x128xi1>, vector<1x128xf32>
    %145 = arith.addf %139, %144 : vector<1x128xf32>
    %c64_i32 = arith.constant 64 : i32
    %146 = tpu.dynamic_rotate %145 by %c64_i32 dim 1 : vector<1x128xf32>, i32 -> vector<1x128xf32>
    %c64_i32_54 = arith.constant 64 : i32
    %147 = vector.broadcast %c64_i32_54 : i32 to vector<1x128xi32>
    %148 = arith.cmpi sge, %88, %147 : vector<1x128xi32>
    %cst_55 = arith.constant 0.000000e+00 : f32
    %149 = vector.broadcast %cst_55 : f32 to vector<1x128xf32>
    %150 = arith.select %148, %146, %149 : vector<1x128xi1>, vector<1x128xf32>
    %151 = arith.addf %145, %150 : vector<1x128xf32>
    %152 = vector.broadcast %2 : f32 to vector<1x128xf32>
    %153 = arith.cmpf olt, %151, %152 : vector<1x128xf32>
    %c5_i32_56 = arith.constant 5 : i32
    %154 = vector.broadcast %c5_i32_56 : i32 to vector<1x128xi32>
    %155 = arith.cmpi slt, %88, %154 : vector<1x128xi32>
    %156 = arith.ori %153, %155 : vector<1x128xi1>
    %cst_57 = arith.constant -1.000000e+03 : f32
    %157 = vector.broadcast %cst_57 : f32 to vector<1x128xf32>
    %158 = arith.select %156, %100, %157 : vector<1x128xi1>, vector<1x128xf32>
    %c50_i32_58 = arith.constant 50 : i32
    %159 = vector.broadcast %c50_i32_58 : i32 to vector<1x128xi32>
    %160 = arith.cmpi slt, %88, %159 : vector<1x128xi32>
    %cst_59 = arith.constant 0xFF800000 : f32
    %161 = vector.broadcast %cst_59 : f32 to vector<1x128xf32>
    %162 = arith.select %160, %158, %161 : vector<1x128xi1>, vector<1x128xf32>
    %cst_60 = arith.constant dense<0xFF800000> : vector<1xf32>
    %163 = vector.multi_reduction <maximumf>, %162, %cst_60 [1] : vector<1x128xf32> to vector<1xf32>
    %164 = vector.shape_cast %163 : vector<1xf32> to vector<1x1xf32>
    %165 = vector.broadcast %164 : vector<1x1xf32> to vector<1x128xf32>
    %166 = arith.subf %162, %165 : vector<1x128xf32>
    %167 = math.exp %166 : vector<1x128xf32>
    %cst_61 = arith.constant dense<0.000000e+00> : vector<1xf32>
    %168 = vector.multi_reduction <add>, %167, %cst_61 [1] : vector<1x128xf32> to vector<1xf32>
    %169 = vector.shape_cast %168 : vector<1xf32> to vector<1x1xf32>
    %170 = vector.broadcast %169 : vector<1x1xf32> to vector<1x128xf32>
    %171 = arith.divf %167, %170 : vector<1x128xf32>
    %c0_62 = arith.constant 0 : index
    %c0_63 = arith.constant 0 : index
    %172 = vector.load %arg5[%c0_62, %c0_63] : memref<1x128xf32, #tpu.memory_space<vmem>>, vector<1x128xf32>
    tpu.vector_store %arg5[%c0_62, %c0_63], %171 {strides = array<i32>} : memref<1x128xf32, #tpu.memory_space<vmem>>, vector<1x128xf32>,
    %c0_64 = arith.constant 0 : index
    %c0_65 = arith.constant 0 : index
    %173 = vector.load %arg6[%c0_64, %c0_65] : memref<1x128xi32, #tpu.memory_space<vmem>>, vector<1x128xi32>
    tpu.vector_store %arg6[%c0_64, %c0_65], %98#2 {strides = array<i32>} : memref<1x128xi32, #tpu.memory_space<vmem>>, vector<1x128xi32>,
    return
  }
}

</mosaic_0001>

<bundles_post_ra>
// kernel: tpu_custom_call.1
= control target key start
LH: loop header
LB: loop body
LE: loop exit
PB: predicated region body
PF: predicated region fallthrough
CT: control target
= control target key end

     0   :  { %15 = vsyncpa [#allocation8], 0  ;;  %s669_s0 = inlined_call_operand.hbm [shape: f32[8,128], index: 0, kind: input, shape index: {}]   ;;  %s670_s1 = inlined_call_operand.vmem [shape: s32[8], index: 1, kind: input, shape index: {}]   ;;  %s671_s2 = inlined_call_operand.<no memory space> [shape: f32[1], index: 2, kind: input, shape index: {}]   ;;  %s672_s3 = inlined_call_operand.<no memory space> [shape: f32[1], index: 3, kind: input, shape index: {}]   ;;  %s673_s4 = inlined_call_operand.<no memory space> [shape: f32[1], index: 4, kind: input, shape index: {}]   ;;  %s674_s5 = inlined_call_operand.hbm [shape: f32[1,128], index: 5, kind: output, shape index: {0}]   ;;  %s675_s6 = inlined_call_operand.hbm [shape: s32[1,128], index: 6, kind: output, shape index: {1}]  }
   0x1   :  { %16 = vsyncpa [#allocation10], 0 }
   0x2   :  { %17 = vsyncpa [#allocation9], 0 }
   0x3   :  { %18 = vsyncpa [#allocation14], 0  ;;  %s35_s23 = sshll.u32 %s670_s1, 4  ;;  %s514_s24 = smov [#allocation7]   ;;  %s36_s23 = int_to_ptr.vmem [resolvable:$true] %s35_s23 }
   0x4   :  { %s25_s25 = sshll.u32 %s514_s24, 4  ;;  %s26_s25 = int_to_ptr.vmem [resolvable:$true] %s25_s25 }
   0x5   :  { %s410_s26 = scalar_lea.vmem %s26_s25, 128  ;;  %p415_p1 = scmp.lt.s32.totalorder %s26_s25, %s26_s25 }
   0x6   :  { %p411_p0 = scmp.ne.s32.totalorder %s26_s25, %s410_s26  ;;  %p416_p2 = scmp.lt.s32.totalorder %s410_s26, %s410_s26 }
   0x8   :  { %p417_p3 = por %p416_p2, %p415_p1 }
   0xa   :  { %p418_p4 = pnand %p417_p3, %p411_p0 }
   0xc   :  { %421 = shalt.err (!%p418_p4)
}
   0xd   :  { %28 = dma.hbm_to_vmem [thread:$0]  %s669_s0, 128, %s26_s25, [#allocation8]  }
   0xe   :  { %s422_s29 = scalar_lea.vmem %s36_s23, 16  ;;  %p427_p6 = scmp.lt.s32.totalorder %s36_s23, %s36_s23 }
   0xf   :  { %p423_p5 = scmp.ne.s32.totalorder %s36_s23, %s422_s29  ;;  %p428_p7 = scmp.lt.s32.totalorder %s422_s29, %s422_s29 }
  0x11   :  { %p429_p8 = por %p428_p7, %p427_p6 }
  0x13   :  { %p430_p9 = pnand %p429_p8, %p423_p5 }
  0x15   :  { %433 = shalt.err (!%p430_p9)
}
  0x16   :  { %s515_s1 = smov [#allocation11]  }
  0x17   :  { %38 = dma.vmem_to_smem %s36_s23, 16, %s515_s1, [#allocation10]  }
  0x18   :  { %490 = dma.done.wait [#allocation8], 128  }
  0x19   :  { %491 = vsyncadd [#allocation8], 4294967168 }
  0x1a   :  { %492 = dma.done.wait [#allocation10], 16  }
  0x1b   :  { %493 = vsyncadd [#allocation10], 4294967280 }
  0x1c   :  { %51 = sfence }
  0x1d   :  { %v53_v0 = vstv %s673_s4  ;;  %v58_v2 = vlaneseq  ;;  %s65_s0 = sld [smem:[#allocation11]]  ;;  %v516_v9 = vmov 0   ;;  %v64_v23 = vld [vmem:[#allocation7] sm:$0xff]  ;;  %v586_v36 = vmov 0   ;;  %s592_s15 = smov 0  }
  0x1e   :  { %390 = vrcp.f32 %v53_v0  ;;  %s328_s8 = sld [smem:[#allocation11 + $0x1]]  ;;  %v99_v25 = vmul.f32 %v64_v23, %v53_v0  ;;  %vm97_vm8 = vcmp.lt.f32.partialorder %v64_v23, 0.0  ;;  %v588_v37 = vmov -inf  }
  0x1f   :  { %v570_v3 = vshrl.u32 %v58_v2, 7  ;;  %v573_v5 = vand.u32 127, %v58_v2  ;;  %s329_s9 = sld [smem:[#allocation11 + $0x2]] }
  0x20   :  { %s330_s10 = sld [smem:[#allocation11 + $0x3]] }
  0x21   :  { %v60_v4 = vmul.u32 128, %v570_v3  ;;  %s331_s4 = sld [smem:[#allocation11 + $0x4]] }
  0x22   :  { %s332_s11 = sld [smem:[#allocation11 + $0x5]] }
  0x23   :  { %v576_v6 = vadd.s32 %v573_v5, %v60_v4  ;;  %v66_v7 = vstv %s65_s0  ;;  %s333_s12 = sld [smem:[#allocation11 + $0x6]] }
  0x24   :  { %v70_v8 = vstv %s328_s8  ;;  %s334_s13 = sld [smem:[#allocation11 + $0x7]] }
  0x25   :  { %vm67_vm0 = vcmp.eq.s32.totalorder %v576_v6, %v66_v7  ;;  %vm71_vm1 = vcmp.eq.s32.totalorder %v576_v6, %v70_v8  ;;  %v74_v11 = vstv %s329_s9 }
  0x26   :  { %v68_v10 = vsel %vm67_vm0, 1, %v516_v9  ;;  %vm75_vm2 = vcmp.eq.s32.totalorder %v576_v6, %v74_v11  ;;  %v78_v13 = vstv %s330_s10 }
  0x27   :  { %v72_v12 = vsel %vm71_vm1, 1, %v68_v10  ;;  %vm79_vm3 = vcmp.eq.s32.totalorder %v576_v6, %v78_v13  ;;  %v82_v15 = vstv %s331_s4 }
  0x28   :  { %v76_v14 = vsel %vm75_vm2, 1, %v72_v12  ;;  %vm83_vm4 = vcmp.eq.s32.totalorder %v576_v6, %v82_v15  ;;  %v86_v17 = vstv %s332_s11 }
  0x29   :  { %v80_v16 = vsel %vm79_vm3, 1, %v76_v14  ;;  %vm87_vm5 = vcmp.eq.s32.totalorder %v576_v6, %v86_v17  ;;  %v90_v19 = vstv %s333_s12 }
  0x2a   :  { %v84_v18 = vsel %vm83_vm4, 1, %v80_v16  ;;  %vm91_vm6 = vcmp.eq.s32.totalorder %v576_v6, %v90_v19  ;;  %v94_v21 = vstv %s334_s13 }
  0x2b   :  { %v391_v1 = vpop.eup %390  ;;  %v88_v20 = vsel %vm87_vm5, 1, %v84_v18  ;;  %vm95_vm7 = vcmp.eq.s32.totalorder %v576_v6, %v94_v21 }
  0x2c   :  { %338 = vpush %v391_v1  ;;  %v92_v22 = vsel %vm91_vm6, 1, %v88_v20 }
  0x2d   :  { %v96_v24 = vsel %vm95_vm7, 1, %v92_v22 }
  0x2e   :  { %vm103_vm9 = vcmp.gt.s32.totalorder %v96_v24, 0 }
  0x5d   :  { %s339_s14 = spop %338 }
  0x5e   :  { %v100_v26 = vstv %s339_s14 }
  0x5f   :  { %v101_v27 = vmul.f32 %v100_v26, %v64_v23 }
  0x61   :  { %v102_v28 = vsel %vm97_vm8, %v99_v25, %v101_v27 }
  0x62   :  { %v104_v29 = vsel %vm103_vm9, %v102_v28, %v64_v23 }
  0x63   :  { %105 = vst [vmem:[#allocation2] sm:$0xff] %v104_v29  ;;  %v106_v30 = vrot.slane %v104_v29, 4 }
  0x65   :  { %v107_v31 = vmax.f32 %v104_v29, %v106_v30 }
  0x67   :  { %v108_v32 = vrot.slane %v107_v31, 2 }
  0x69   :  { %v109_v33 = vmax.f32 %v107_v31, %v108_v32 }
  0x6b   :  { %v110_v34 = vrot.slane %v109_v33, 1 }
  0x6d   :  { %v111_v35 = vmax.f32 %v109_v33, %v110_v34  }
  0x6e LB: > { %vm121_vm10 = vcmask 1040384   ;;  %v209_v46 = vstv %s512_s15  ;;  %s117_s15 = sadd.s32 1, %s512_s15   ;;  %s512_s15 = sphi %s592_s15, %s117_s15   ;;  %v508_v35 = vphi %v111_v35, %v206_v35   ;;  %v504_v37 = vphi %v588_v37, %v680_v37   ;;  %v500_v36 = vphi %v586_v36, %v679_v36  }
  0x6f   : > { %v122_v38 = vsel %vm121_vm10, %v508_v35, -inf  ;;  %vm608_vm11 = vcmp.eq.s32.totalorder %v573_v5, %v209_v46  ;;  %p114_p11 = scmp.ge.s32.totalorder %s117_s15, 50  }
  0x70   : > { %123 = vmax.xlane.f32.xlu0 %v122_v38  ;;  %s517_s25 = smov (%p114_p11), 1   ;;  %vm228_vm8 = vcmp.ge.s32.totalorder (%p114_p11), %v573_v5, 1  ;;  %vm233_vm9 = vcmp.ge.s32.totalorder (%p114_p11), %v573_v5, 2  ;;  %s519_s26 = smov (%p114_p11), 4  }
  0x71   :  { %s520_s27 = smov (%p114_p11), 8   ;;  %s521_s28 = smov (%p114_p11), 16  }
  0x72   :  { %s522_s29 = smov (%p114_p11), 32   ;;  %s523_s1 = smov (%p114_p11), 64  }
  0xf9   : > { %v124_v39 = vpop.xlane.xlu0 %123 }
  0xfa   : > { %v125_v40 = vrot.slane %v124_v39, 4 }
  0xfc   : > { %v126_v41 = vmax.f32 %v124_v39, %v125_v40  ;;  %v214_v40 = vstv (%p114_p11), %s672_s3  ;;  %s518_s3 = smov (%p114_p11), 2  }
  0xfd   :  { %392 = vrcp.f32 (%p114_p11), %v214_v40 }
  0xfe   : > { %v127_v42 = vrot.slane %v126_v41, 2 }
 0x100   : > { %v128_v43 = vmax.f32 %v126_v41, %v127_v42 }
 0x102   : > { %v129_v44 = vrot.slane %v128_v43, 1 }
 0x104   : > { %v130_v45 = vmax.f32 %v128_v43, %v129_v44 }
 0x106   : > { %340 = vpush %v130_v45 }
 0x10a   :  { %v393_v41 = vpop.eup (%p114_p11), %392 }
 0x137   : > { %s341_s16 = spop %340 }
 0x138   : > { %v132_v48 = vstv %s341_s16 }
 0x139   : > { %vm133_vm12 = vcmp.eq.f32.partialorder %v508_v35, %v132_v48  ;;  %v615_v37 = vsel %vm608_vm11, %v132_v48, %v504_v37  }
 0x13a   : > { %v678_v49 = vmov %v615_v37  ;;  %v134_v50 = vsel %vm133_vm12, %v570_v3, 1  ;;  %vm243_vm12 = vcmp.ge.s32.totalorder (%p114_p11), %v573_v5, 8 }
 0x13b   : > { %v135_v51 = vsel %vm121_vm10, %v134_v50, 2147483647  ;;  %v216_v42 = vmul.f32 (%p114_p11), %v393_v41, %v678_v49 }
 0x13c   : > { %v137_v52 = vshra.s32 %v135_v51, 16  ;;  %v136_v54 = vand.u32 65535, %v135_v51 }
 0x13e   : > { %v139_v53 = vcvt.s32.f32 %v137_v52  ;;  %v138_v56 = vcvt.s32.f32 %v136_v54 }
 0x140   : > { %140 = vmin.xlane.f32.xlu0 %v139_v53 }
 0x1c9   : > { %v141_v55 = vpop.xlane.xlu0 %140 }
 0x1ca   : > { %vm142_vm13 = vcmp.eq.f32.partialorder %v139_v53, %v141_v55  ;;  %v147_v58 = vcvt.f32.s32 %v141_v55 }
 0x1cb   : > { %v143_v57 = vsel %vm142_vm13, %v138_v56, inf  ;;  %vm248_vm13 = vcmp.ge.s32.totalorder (%p114_p11), %v573_v5, 16 }
 0x1cc   : > { %144 = vmin.xlane.f32.xlu1 %v143_v57  ;;  %v148_v60 = vshll.u32 %v147_v58, 16 }
 0x255   : > { %v145_v59 = vpop.xlane.xlu1 %144 }
 0x256   : > { %v146_v61 = vcvt.f32.s32 %v145_v59 }
 0x258   : > { %v149_v62 = vadd.s32 %v148_v60, %v146_v61 }
 0x25a   : > { %v150_v63 = vrot.slane %v149_v62, 4 }
 0x25c   : > { %vm151_vm14 = vcmp.lt.s32.totalorder %v149_v62, %v150_v63 }
 0x25d   : > { %v152_v0 = vsel %vm151_vm14, %v149_v62, %v150_v63  ;;  %vm253_vm14 = vcmp.ge.s32.totalorder (%p114_p11), %v573_v5, 32 }
 0x25e   : > { %v153_v1 = vrot.slane %v152_v0, 2 }
 0x260   : > { %vm154_vm15 = vcmp.lt.s32.totalorder %v152_v0, %v153_v1 }
 0x261   : > { %v155_v2 = vsel %vm154_vm15, %v152_v0, %v153_v1  ;;  %vm258_vm15 = vcmp.ge.s32.totalorder (%p114_p11), %v573_v5, 64  ;;  %v261_v1 = vstv (%p114_p11), %s671_s2  ;;  %s524_s2 = smov (%p114_p11), [#allocation13]  }
 0x262   : > { %v156_v4 = vrot.slane %v155_v2, 1  ;;  %s298_s0 = sshll.u32 (%p114_p11), %s524_s2, 4  ;;  %s299_s0 = int_to_ptr.vmem [resolvable:$true] %s298_s0 }
 0x263   :  { %s434_s8 = scalar_lea.vmem (%p114_p11), %s299_s0, 16  ;;  %s438_s9 = scalar_lea.vmem (%p114_p11), %s299_s0, 32 }
 0x264   : > { %vm157_vm0 = vcmp.lt.s32.totalorder %v155_v2, %v156_v4  ;;  %p435_p12 = scmp.ne.s32.totalorder (%p114_p11), %s299_s0, %s434_s8  ;;  %p439_p13 = scmp.lt.s32.totalorder (%p114_p11), %s299_s0, %s299_s0 }
 0x265   : > { %v158_v7 = vsel %vm157_vm0, %v155_v2, %v156_v4  ;;  %vm263_vm0 = vcmp.lt.s32.totalorder (%p114_p11), %v573_v5, 5  ;;  %p440_p0 = scmp.lt.s32.totalorder (%p114_p11), %s438_s9, %s434_s8 }
 0x266   : > { %342 = vpush %v158_v7 }
 0x267   :  { %p441_p1 = por (%p114_p11), %p440_p0, %p439_p13 }
 0x269   :  { %p442_p2 = pnand (%p114_p11), %p441_p1, %p435_p12 }
 0x297   : > { %s343_s17 = spop %342 }
 0x298   : > { %p160_p10 = scmp.lt.s32.totalorder %s343_s17, 0 }
 0x29a   : > { %s682_s17 = smov (!%p160_p10, %s343_s17), 0 }
 0x29b   : > { %s335_s18 = sshll.u32 %s682_s17, 3  ;;  %s337_s21 = sshll.u32 %s682_s17, 10  ;;  %v204_v37 = vstv %s682_s17 }
 0x29c   : > { %s622_s19 = scalar_lea.vmem [#allocation2], %s335_s18  ;;  %vm205_vm7 = vcmp.eq.s32.totalorder %v570_v3, %v204_v37  ;;  %v680_v37 = vmov %v678_v49 }
 0x29d   : > { %v167_v8 = vld [vmem:[%s622_s19] sm:$0xff] }
 0x29e   : > { %vm168_vm1 = vcmp.eq.f32.partialorder %v167_v8, %v132_v48 }
 0x29f   : > { %v169_v9 = vsel %vm168_vm1, %v576_v6, 1024 }
 0x2a0   : > { %v171_v10 = vshra.s32 %v169_v9, 16  ;;  %v170_v12 = vand.u32 65535, %v169_v9 }
 0x2a2   : > { %v173_v11 = vcvt.s32.f32 %v171_v10  ;;  %v172_v14 = vcvt.s32.f32 %v170_v12 }
 0x2a4   : > { %174 = vmin.xlane.f32.xlu1 %v173_v11 }
 0x32d   : > { %v175_v13 = vpop.xlane.xlu1 %174 }
 0x32e   : > { %vm176_vm2 = vcmp.eq.f32.partialorder %v173_v11, %v175_v13  ;;  %v181_v16 = vcvt.f32.s32 %v175_v13 }
 0x32f   : > { %v177_v15 = vsel %vm176_vm2, %v172_v14, inf  ;;  %vm266_vm2 = vcmp.lt.s32.totalorder (%p114_p11), %v573_v5, 50 }
 0x330   : > { %178 = vmin.xlane.f32.xlu0 %v177_v15  ;;  %v182_v18 = vshll.u32 %v181_v16, 16 }
 0x334   :  { %217 = vmax.xlane.f32.xlu0 (%p114_p11), %v216_v42 }
 0x3b9   : > { %v179_v17 = vpop.xlane.xlu0 %178 }
 0x3ba   : > { %v180_v19 = vcvt.f32.s32 %v179_v17 }
 0x3bc   : > { %v183_v20 = vadd.s32 %v182_v18, %v180_v19 }
 0x3bd   :  { %v218_v43 = vpop.xlane.xlu0 (%p114_p11), %217 }
 0x3be   : > { %v184_v21 = vrot.slane %v183_v20, 4  ;;  %v219_v44 = vsub.f32 (%p114_p11), %v216_v42, %v218_v43 }
 0x3c0   : > { %vm185_vm3 = vcmp.lt.s32.totalorder %v183_v20, %v184_v21  ;;  %v220_v45 = vmul.f32 (%p114_p11), 1.442695, %v219_v44 }
 0x3c1   : > { %v186_v22 = vsel %vm185_vm3, %v183_v20, %v184_v21 }
 0x3c2   : > { %v187_v23 = vrot.slane %v186_v22, 2  ;;  %394 = vpow2.f32 (%p114_p11), %v220_v45 }
 0x3c4   : > { %vm188_vm4 = vcmp.lt.s32.totalorder %v186_v22, %v187_v23 }
 0x3c5   : > { %v189_v24 = vsel %vm188_vm4, %v186_v22, %v187_v23 }
 0x3c6   : > { %v190_v25 = vrot.slane %v189_v24, 1 }
 0x3c8   : > { %vm191_vm5 = vcmp.lt.s32.totalorder %v189_v24, %v190_v25 }
 0x3c9   : > { %v192_v26 = vsel %vm191_vm5, %v189_v24, %v190_v25 }
 0x3ca   : > { %344 = vpush %v192_v26 }
 0x3cf   :  { %v395_v46 = vpop.eup (%p114_p11), %394 }
 0x3d0   :  { %222 = vadd.xlane.f32.xlu0 (%p114_p11), %v395_v46 }
 0x3fb   : > { %s345_s20 = spop %344 }
 0x3fc   : > { %v194_v27 = vstv %s345_s20  ;;  %s208_s22 = sadd.s32 %s345_s20, %s337_s21 }
 0x3fd   : > { %vm195_vm6 = vcmp.eq.s32.totalorder %v576_v6, %v194_v27  ;;  %v212_v28 = vstv %s208_s22 }
 0x3fe   : > { %v196_v29 = vsel %vm195_vm6, -inf, %v167_v8  ;;  %v213_v30 = vsel %vm608_vm11, %v212_v28, %v500_v36   ;;  %vm238_vm11 = vcmp.ge.s32.totalorder (%p114_p11), %v573_v5, 4 }
 0x3ff   : > { %197 = vst [vmem:[%s622_s19] sm:$0xff] %v196_v29  ;;  %v198_v31 = vrot.slane %v196_v29, 4  ;;  %v679_v36 = vmov %v213_v30  ;;  %281 = vst [vmem:[#allocation13] sm:$0x1] (%p114_p11), %v213_v30 }
 0x401   : > { %v199_v32 = vmax.f32 %v196_v29, %v198_v31 }
 0x403   : > { %v200_v33 = vrot.slane %v199_v32, 2 }
 0x405   : > { %v201_v34 = vmax.f32 %v199_v32, %v200_v33 }
 0x407   : > { %v202_v38 = vrot.slane %v201_v34, 1  ;;  %116 = sbr.rel (!%p114_p11) target bundleno = 110 (0x6e), region = 65 }
 0x409   : > { %v203_v39 = vmax.f32 %v201_v34, %v202_v38 }
 0x40b   : > { %v206_v35 = vsel %vm205_vm7, %v203_v39, %v508_v35  }
 0x459   :  { %v223_v35 = vpop.xlane.xlu0 %222 }
 0x45a   :  { %396 = vrcp.f32 %v223_v35 }
 0x467   :  { %v397_v47 = vpop.eup %396 }
 0x468   :  { %v225_v48 = vmul.f32 %v397_v47, %v395_v46 }
 0x46a   :  { %226 = vrot.lane.b32.xlu1 %v225_v48, %s517_s25 }
 0x4dc   :  { %v227_v3 = vpop.permute.xlu1 %226 }
 0x4dd   :  { %v229_v6 = vsel %vm228_vm8, %v227_v3, 0.0 }
 0x4de   :  { %v230_v36 = vadd.f32 %v229_v6, %v225_v48 }
 0x4e0   :  { %231 = vrot.lane.b32.xlu1 %v230_v36, %s518_s3 }
 0x552   :  { %v232_v49 = vpop.permute.xlu1 %231 }
 0x553   :  { %v234_v50 = vsel %vm233_vm9, %v232_v49, 0.0 }
 0x554   :  { %v235_v51 = vadd.f32 %v234_v50, %v230_v36 }
 0x556   :  { %236 = vrot.lane.b32.xlu0 %v235_v51, %s519_s26 }
 0x5c8   :  { %v237_v52 = vpop.permute.xlu0 %236 }
 0x5c9   :  { %v239_v53 = vsel %vm238_vm11, %v237_v52, 0.0 }
 0x5ca   :  { %v240_v54 = vadd.f32 %v239_v53, %v235_v51 }
 0x5cc   :  { %241 = vrot.lane.b32.xlu1 %v240_v54, %s520_s27 }
 0x63e   :  { %v242_v55 = vpop.permute.xlu1 %241 }
 0x63f   :  { %v244_v56 = vsel %vm243_vm12, %v242_v55, 0.0 }
 0x640   :  { %v245_v57 = vadd.f32 %v244_v56, %v240_v54 }
 0x642   :  { %246 = vrot.lane.b32.xlu1 %v245_v57, %s521_s28 }
 0x6b4   :  { %v247_v58 = vpop.permute.xlu1 %246 }
 0x6b5   :  { %v249_v59 = vsel %vm248_vm13, %v247_v58, 0.0 }
 0x6b6   :  { %v250_v60 = vadd.f32 %v249_v59, %v245_v57 }
 0x6b8   :  { %251 = vrot.lane.b32.xlu1 %v250_v60, %s522_s29 }
 0x72a   :  { %v252_v61 = vpop.permute.xlu1 %251 }
 0x72b   :  { %v254_v62 = vsel %vm253_vm14, %v252_v61, 0.0 }
 0x72c   :  { %v255_v63 = vadd.f32 %v254_v62, %v250_v60 }
 0x72e   :  { %256 = vrot.lane.b32.xlu1 %v255_v63, %s523_s1 }
 0x7a0   :  { %v257_v0 = vpop.permute.xlu1 %256 }
 0x7a1   :  { %v259_v2 = vsel %vm258_vm15, %v257_v0, 0.0 }
 0x7a2   :  { %v260_v4 = vadd.f32 %v259_v2, %v255_v63 }
 0x7a4   :  { %vm262_vm1 = vcmp.lt.f32.partialorder %v260_v4, %v261_v1 }
 0x7a5   :  { %vm264_vm3 = vmor %vm262_vm1, %vm263_vm0 }
 0x7a6   :  { %v265_v7 = vsel %vm264_vm3, %v216_v42, -1000.0 }
 0x7a7   :  { %v267_v8 = vsel %vm266_vm2, %v265_v7, -inf }
 0x7a8   :  { %v269_v9 = vsel %vm121_vm10, %v267_v8, -inf }
 0x7a9   :  { %270 = vmax.xlane.f32.xlu1 %v269_v9 }
 0x832   :  { %v271_v10 = vpop.xlane.xlu1 %270 }
 0x833   :  { %v272_v11 = vsub.f32 %v267_v8, %v271_v10 }
 0x835   :  { %v273_v12 = vmul.f32 1.442695, %v272_v11 }
 0x837   :  { %398 = vpow2.f32 %v273_v12 }
 0x844   :  { %v399_v13 = vpop.eup %398 }
 0x845   :  { %v275_v14 = vsel %vm121_vm10, %v399_v13, 0.0 }
 0x846   :  { %276 = vadd.xlane.f32.xlu0 %v275_v14 }
 0x847   :  { %445 = shalt.err (!%p442_p2)
}
 0x848   :  { %301 = dma.vmem_to_hbm [thread:$0]  %s299_s0, 16, %s675_s6, [#allocation14]  }
 0x849   :  { %s525_s11 = smov [#allocation12]  }
 0x84a   :  { %s288_s12 = sshll.u32 %s525_s11, 4  ;;  %s289_s12 = int_to_ptr.vmem [resolvable:$true] %s288_s12 }
 0x84b   :  { %s454_s13 = scalar_lea.vmem %s289_s12, 16  ;;  %s458_s14 = scalar_lea.vmem %s289_s12, 32 }
 0x84c   :  { %p455_p3 = scmp.ne.s32.totalorder %s289_s12, %s454_s13  ;;  %p459_p4 = scmp.lt.s32.totalorder %s289_s12, %s289_s12 }
 0x84d   :  { %p460_p5 = scmp.lt.s32.totalorder %s458_s14, %s454_s13 }
 0x84f   :  { %p461_p6 = por %p460_p5, %p459_p4 }
 0x851   :  { %p462_p7 = pnand %p461_p6, %p455_p3 }
 0x8cf   :  { %v277_v5 = vpop.xlane.xlu0 %276 }
 0x8d0   :  { %400 = vrcp.f32 %v277_v5 }
 0x8dd   :  { %v401_v15 = vpop.eup %400 }
 0x8de   :  { %v279_v16 = vmul.f32 %v401_v15, %v399_v13 }
 0x8e0   :  { %280 = vst [vmem:[#allocation12] sm:$0x1] %v279_v16 }
 0x8e1   :  { %465 = shalt.err (!%p462_p7)
}
 0x8e2   :  { %291 = dma.vmem_to_hbm [thread:$0]  %s289_s12, 16, %s674_s5, [#allocation9]  }
 0x8e3   :  { %494 = dma.done.wait [#allocation9], 16  }
 0x8e4   :  { %495 = vsyncadd [#allocation9], 4294967280 }
 0x8e5   :  { %496 = dma.done.wait [#allocation14], 16  }
 0x8e6   :  { %497 = vsyncadd [#allocation14], 4294967280 }
 0x8e7   :  { %308 = vsyncpa [#allocation8], 1 }
 0x8e8   :  { %309 = vsyncpa [#allocation9], 1 }
 0x8e9   :  { %310 = vsyncpa [#allocation14], 1 }
 0x8ea   :  { %311 = vsyncpa [#allocation10], 1 }

// kernel: tpu_custom_call.1
= control target key start
LH: loop header
LB: loop body
LE: loop exit
PB: predicated region body
PF: predicated region fallthrough
CT: control target
= control target key end

     0   :  { %15 = vsyncpa [#allocation8], 0  ;;  %s562_s0 = inlined_call_operand.hbm [shape: f32[8,128], index: 0, kind: input, shape index: {}]   ;;  %s563_s1 = inlined_call_operand.vmem [shape: s32[8], index: 1, kind: input, shape index: {}]   ;;  %s564_s2 = inlined_call_operand.<no memory space> [shape: f32[1], index: 2, kind: input, shape index: {}]   ;;  %s565_s3 = inlined_call_operand.<no memory space> [shape: f32[1], index: 3, kind: input, shape index: {}]   ;;  %s566_s4 = inlined_call_operand.<no memory space> [shape: f32[1], index: 4, kind: input, shape index: {}]   ;;  %s567_s5 = inlined_call_operand.hbm [shape: f32[1,128], index: 5, kind: output, shape index: {0}]   ;;  %s568_s6 = inlined_call_operand.hbm [shape: s32[1,128], index: 6, kind: output, shape index: {1}]  }
   0x1   :  { %16 = vsyncpa [#allocation10], 0 }
   0x2   :  { %17 = vsyncpa [#allocation9], 0 }
   0x3   :  { %18 = vsyncpa [#allocation14], 0  ;;  %s35_s23 = sshll.u32 %s563_s1, 4  ;;  %s452_s24 = smov [#allocation7]   ;;  %s36_s23 = int_to_ptr.vmem [resolvable:$true] %s35_s23 }
   0x4   :  { %s25_s25 = sshll.u32 %s452_s24, 4  ;;  %s26_s25 = int_to_ptr.vmem [resolvable:$true] %s25_s25 }
   0x5   :  { %s348_s26 = scalar_lea.vmem %s26_s25, 128  ;;  %p353_p1 = scmp.lt.s32.totalorder %s26_s25, %s26_s25 }
   0x6   :  { %p349_p0 = scmp.ne.s32.totalorder %s26_s25, %s348_s26  ;;  %p354_p2 = scmp.lt.s32.totalorder %s348_s26, %s348_s26 }
   0x8   :  { %p355_p3 = por %p354_p2, %p353_p1 }
   0xa   :  { %p356_p4 = pnand %p355_p3, %p349_p0 }
   0xc   :  { %359 = shalt.err (!%p356_p4)
}
   0xd   :  { %28 = dma.hbm_to_vmem [thread:$0]  %s562_s0, 128, %s26_s25, [#allocation8]  }
   0xe   :  { %s360_s29 = scalar_lea.vmem %s36_s23, 16  ;;  %p365_p6 = scmp.lt.s32.totalorder %s36_s23, %s36_s23 }
   0xf   :  { %p361_p5 = scmp.ne.s32.totalorder %s36_s23, %s360_s29  ;;  %p366_p7 = scmp.lt.s32.totalorder %s360_s29, %s360_s29 }
  0x11   :  { %p367_p8 = por %p366_p7, %p365_p6 }
  0x13   :  { %p368_p9 = pnand %p367_p8, %p361_p5 }
  0x15   :  { %371 = shalt.err (!%p368_p9)
}
  0x16   :  { %s453_s1 = smov [#allocation11]  }
  0x17   :  { %38 = dma.vmem_to_smem %s36_s23, 16, %s453_s1, [#allocation10]  }
  0x18   :  { %428 = dma.done.wait [#allocation8], 128  }
  0x19   :  { %429 = vsyncadd [#allocation8], 4294967168 }
  0x1a   :  { %430 = dma.done.wait [#allocation10], 16  }
  0x1b   :  { %431 = vsyncadd [#allocation10], 4294967280 }
  0x1c   :  { %51 = sfence }
  0x1d   :  { %v53_v0 = vstv %s566_s4  ;;  %v58_v2 = vlaneseq  ;;  %s65_s0 = sld [smem:[#allocation11]]  ;;  %v454_v9 = vmov 0   ;;  %v64_v23 = vld [vmem:[#allocation7] sm:$0xff]  ;;  %v436_v30 = vmov 0   ;;  %s521_s15 = smov 0  }
  0x1e   :  { %328 = vrcp.f32 %v53_v0  ;;  %s271_s8 = sld [smem:[#allocation11 + $0x1]]  ;;  %v99_v25 = vmul.f32 %v64_v23, %v53_v0  ;;  %vm97_vm8 = vcmp.lt.f32.partialorder %v64_v23, 0.0  ;;  %v440_v31 = vmov -inf  }
  0x1f   :  { %v59_v3 = vshrl.u32 %v58_v2, 7  ;;  %v508_v5 = vand.u32 127, %v58_v2  ;;  %s272_s9 = sld [smem:[#allocation11 + $0x2]] }
  0x20   :  { %s273_s10 = sld [smem:[#allocation11 + $0x3]] }
  0x21   :  { %v60_v4 = vmul.u32 128, %v59_v3  ;;  %s274_s4 = sld [smem:[#allocation11 + $0x4]] }
  0x22   :  { %s275_s11 = sld [smem:[#allocation11 + $0x5]] }
  0x23   :  { %v511_v6 = vadd.s32 %v508_v5, %v60_v4  ;;  %v66_v7 = vstv %s65_s0  ;;  %s276_s12 = sld [smem:[#allocation11 + $0x6]] }
  0x24   :  { %v70_v8 = vstv %s271_s8  ;;  %s277_s13 = sld [smem:[#allocation11 + $0x7]] }
  0x25   :  { %vm67_vm0 = vcmp.eq.s32.totalorder %v511_v6, %v66_v7  ;;  %vm71_vm1 = vcmp.eq.s32.totalorder %v511_v6, %v70_v8  ;;  %v74_v11 = vstv %s272_s9 }
  0x26   :  { %v68_v10 = vsel %vm67_vm0, 1, %v454_v9  ;;  %vm75_vm2 = vcmp.eq.s32.totalorder %v511_v6, %v74_v11  ;;  %v78_v13 = vstv %s273_s10 }
  0x27   :  { %v72_v12 = vsel %vm71_vm1, 1, %v68_v10  ;;  %vm79_vm3 = vcmp.eq.s32.totalorder %v511_v6, %v78_v13  ;;  %v82_v15 = vstv %s274_s4 }
  0x28   :  { %v76_v14 = vsel %vm75_vm2, 1, %v72_v12  ;;  %vm83_vm4 = vcmp.eq.s32.totalorder %v511_v6, %v82_v15  ;;  %v86_v17 = vstv %s275_s11 }
  0x29   :  { %v80_v16 = vsel %vm79_vm3, 1, %v76_v14  ;;  %vm87_vm5 = vcmp.eq.s32.totalorder %v511_v6, %v86_v17  ;;  %v90_v19 = vstv %s276_s12 }
  0x2a   :  { %v84_v18 = vsel %vm83_vm4, 1, %v80_v16  ;;  %vm91_vm6 = vcmp.eq.s32.totalorder %v511_v6, %v90_v19  ;;  %v94_v21 = vstv %s277_s13 }
  0x2b   :  { %v329_v1 = vpop.eup %328  ;;  %v88_v20 = vsel %vm87_vm5, 1, %v84_v18  ;;  %vm95_vm7 = vcmp.eq.s32.totalorder %v511_v6, %v94_v21 }
  0x2c   :  { %278 = vpush %v329_v1  ;;  %v92_v22 = vsel %vm91_vm6, 1, %v88_v20 }
  0x2d   :  { %v96_v24 = vsel %vm95_vm7, 1, %v92_v22 }
  0x2e   :  { %vm103_vm9 = vcmp.gt.s32.totalorder %v96_v24, 0 }
  0x5d   :  { %s279_s14 = spop %278 }
  0x5e   :  { %v100_v26 = vstv %s279_s14 }
  0x5f   :  { %v101_v27 = vmul.f32 %v100_v26, %v64_v23 }
  0x61   :  { %v102_v28 = vsel %vm97_vm8, %v99_v25, %v101_v27 }
  0x62   :  { %v104_v29 = vsel %vm103_vm9, %v102_v28, %v64_v23  }
  0x63   :  { %v444_v32 = vmov %v104_v29  }
  0x64 LB: > { %116 = vmax.xlane.f32.xlu0 %v446_v32  ;;  %v152_v40 = vstv %s450_s15  ;;  %s112_s15 = sadd.s32 1, %s450_s15   ;;  %s450_s15 = sphi %s521_s15, %s112_s15   ;;  %v446_v32 = vphi %v444_v32, %v158_v32   ;;  %v442_v31 = vphi %v440_v31, %v441_v31   ;;  %v438_v30 = vphi %v436_v30, %v437_v30  }
  0x65   : > { %vm528_vm10 = vcmp.eq.s32.totalorder %v508_v5, %v152_v40  ;;  %p109_p10 = scmp.ge.s32.totalorder %s112_s15, 50  }
  0x66   :  { %v159_v0 = vstv (%p109_p10), %s565_s3  ;;  %s455_s20 = smov (%p109_p10), 1   ;;  %vm173_vm1 = vcmp.ge.s32.totalorder (%p109_p10), %v508_v5, 1  ;;  %s456_s3 = smov (%p109_p10), 2   ;;  %vm178_vm2 = vcmp.ge.s32.totalorder (%p109_p10), %v508_v5, 2  ;;  %vm183_vm3 = vcmp.ge.s32.totalorder (%p109_p10), %v508_v5, 4 }
  0x67   :  { %330 = vrcp.f32 (%p109_p10), %v159_v0  ;;  %s457_s21 = smov (%p109_p10), 4   ;;  %s458_s22 = smov (%p109_p10), 8   ;;  %vm188_vm4 = vcmp.ge.s32.totalorder (%p109_p10), %v508_v5, 8  ;;  %vm193_vm5 = vcmp.ge.s32.totalorder (%p109_p10), %v508_v5, 16  ;;  %vm198_vm6 = vcmp.ge.s32.totalorder (%p109_p10), %v508_v5, 32 }
  0x68   :  { %s459_s23 = smov (%p109_p10), 16   ;;  %s460_s24 = smov (%p109_p10), 32   ;;  %vm203_vm7 = vcmp.ge.s32.totalorder (%p109_p10), %v508_v5, 64  ;;  %vm208_vm8 = vcmp.lt.s32.totalorder (%p109_p10), %v508_v5, 5 }
  0x69   :  { %s461_s25 = smov (%p109_p10), 64  }
  0x74   :  { %v331_v1 = vpop.eup (%p109_p10), %330 }
  0xed   : > { %v117_v33 = vpop.xlane.xlu0 %116 }
  0xee   : > { %v118_v34 = vrot.slane %v117_v33, 4 }
  0xf0   : > { %v119_v35 = vmax.f32 %v117_v33, %v118_v34 }
  0xf2   : > { %v120_v36 = vrot.slane %v119_v35, 2 }
  0xf4   : > { %v121_v37 = vmax.f32 %v119_v35, %v120_v36 }
  0xf6   : > { %v122_v38 = vrot.slane %v121_v37, 1 }
  0xf8   : > { %v123_v39 = vmax.f32 %v121_v37, %v122_v38 }
  0xfa   : > { %280 = vpush %v123_v39 }
 0x12b   : > { %s281_s16 = spop %280 }
 0x12c   : > { %v125_v42 = vstv %s281_s16 }
 0x12d   : > { %vm126_vm11 = vcmp.eq.f32.partialorder %v446_v32, %v125_v42  ;;  %v154_v43 = vsel %vm528_vm10, %v125_v42, %v442_v31  }
 0x12e   : > { %v127_v44 = vsel %vm126_vm11, %v511_v6, 1024  ;;  %v441_v31 = vmov %v154_v43   ;;  %v161_v2 = vmul.f32 (%p109_p10), %v331_v1, %v154_v43 }
 0x12f   : > { %v129_v45 = vshra.s32 %v127_v44, 16  ;;  %v128_v47 = vand.u32 65535, %v127_v44 }
 0x131   : > { %v131_v46 = vcvt.s32.f32 %v129_v45  ;;  %v130_v49 = vcvt.s32.f32 %v128_v47 }
 0x133   : > { %132 = vmin.xlane.f32.xlu0 %v131_v46 }
 0x137   :  { %162 = vmax.xlane.f32.xlu0 (%p109_p10), %v161_v2 }
 0x1bc   : > { %v133_v48 = vpop.xlane.xlu0 %132 }
 0x1bd   : > { %vm134_vm12 = vcmp.eq.f32.partialorder %v131_v46, %v133_v48  ;;  %v139_v51 = vcvt.f32.s32 %v133_v48 }
 0x1be   : > { %v135_v50 = vsel %vm134_vm12, %v130_v49, inf  ;;  %vm213_vm12 = vcmask (%p109_p10), 1040384  }
 0x1bf   : > { %136 = vmin.xlane.f32.xlu1 %v135_v50  ;;  %v140_v53 = vshll.u32 %v139_v51, 16 }
 0x1c0   :  { %v163_v3 = vpop.xlane.xlu0 (%p109_p10), %162 }
 0x1c1   :  { %v164_v4 = vsub.f32 (%p109_p10), %v161_v2, %v163_v3 }
 0x1c3   :  { %v165_v7 = vmul.f32 (%p109_p10), 1.442695, %v164_v4 }
 0x1c5   :  { %332 = vpow2.f32 (%p109_p10), %v165_v7 }
 0x1d2   :  { %v333_v8 = vpop.eup (%p109_p10), %332 }
 0x1d3   :  { %167 = vadd.xlane.f32.xlu0 (%p109_p10), %v333_v8 }
 0x248   : > { %v137_v52 = vpop.xlane.xlu1 %136 }
 0x249   : > { %v138_v54 = vcvt.f32.s32 %v137_v52 }
 0x24b   : > { %v141_v55 = vadd.s32 %v140_v53, %v138_v54 }
 0x24d   : > { %v142_v56 = vrot.slane %v141_v55, 4 }
 0x24f   : > { %vm143_vm13 = vcmp.lt.s32.totalorder %v141_v55, %v142_v56 }
 0x250   : > { %v144_v57 = vsel %vm143_vm13, %v141_v55, %v142_v56 }
 0x251   : > { %v145_v58 = vrot.slane %v144_v57, 2 }
 0x253   : > { %vm146_vm14 = vcmp.lt.s32.totalorder %v144_v57, %v145_v58 }
 0x254   : > { %v147_v59 = vsel %vm146_vm14, %v144_v57, %v145_v58 }
 0x255   : > { %v148_v60 = vrot.slane %v147_v59, 1 }
 0x257   : > { %vm149_vm15 = vcmp.lt.s32.totalorder %v147_v59, %v148_v60 }
 0x258   : > { %v150_v61 = vsel %vm149_vm15, %v147_v59, %v148_v60 }
 0x259   : > { %282 = vpush %v150_v61 }
 0x25c   :  { %v168_v9 = vpop.xlane.xlu0 (%p109_p10), %167 }
 0x25d   :  { %334 = vrcp.f32 (%p109_p10), %v168_v9 }
 0x26a   :  { %v335_v10 = vpop.eup (%p109_p10), %334 }
 0x26b   :  { %v170_v11 = vmul.f32 (%p109_p10), %v335_v10, %v333_v8 }
 0x26d   :  { %171 = vrot.lane.b32.xlu1 (%p109_p10), %v170_v11, %s455_s20 }
 0x289   :  { %111 = sbr.rel (!%p109_p10) target bundleno = 100 (0x64), region = 63 }
 0x28a   : > { %s283_s17 = spop %282 }
 0x28b   : > { %v155_v62 = vstv %s283_s17 }
 0x28c   : > { %v156_v63 = vsel %vm528_vm10, %v155_v62, %v438_v30   ;;  %vm157_vm0 = vcmp.eq.s32.totalorder %v511_v6, %v155_v62  ;;  %vm211_vm10 = vcmp.lt.s32.totalorder (%p109_p10), %v508_v5, 50 }
 0x28d   : > { %v158_v32 = vsel %vm157_vm0, -inf, %v446_v32   ;;  %v437_v30 = vmov %v156_v63   ;;  %226 = vst [vmem:[#allocation13] sm:$0x1] (%p109_p10), %v156_v63 }
 0x28e   :  { %v206_v30 = vstv %s564_s2  ;;  %s462_s2 = smov [#allocation13]  }
 0x28f   :  { %s243_s28 = sshll.u32 %s462_s2, 4  ;;  %s244_s28 = int_to_ptr.vmem [resolvable:$true] %s243_s28 }
 0x290   :  { %s372_s29 = scalar_lea.vmem %s244_s28, 16  ;;  %s376_s1 = scalar_lea.vmem %s244_s28, 32 }
 0x291   :  { %p373_p11 = scmp.ne.s32.totalorder %s244_s28, %s372_s29  ;;  %p377_p12 = scmp.lt.s32.totalorder %s244_s28, %s244_s28 }
 0x292   :  { %p378_p13 = scmp.lt.s32.totalorder %s376_s1, %s372_s29 }
 0x294   :  { %p379_p0 = por %p378_p13, %p377_p12 }
 0x296   :  { %p380_p1 = pnand %p379_p0, %p373_p11 }
 0x2df   :  { %v172_v6 = vpop.permute.xlu1 %171 }
 0x2e0   :  { %v174_v12 = vsel %vm173_vm1, %v172_v6, 0.0 }
 0x2e1   :  { %v175_v13 = vadd.f32 %v174_v12, %v170_v11 }
 0x2e3   :  { %176 = vrot.lane.b32.xlu1 %v175_v13, %s456_s3 }
 0x355   :  { %v177_v14 = vpop.permute.xlu1 %176 }
 0x356   :  { %v179_v15 = vsel %vm178_vm2, %v177_v14, 0.0 }
 0x357   :  { %v180_v16 = vadd.f32 %v179_v15, %v175_v13 }
 0x359   :  { %181 = vrot.lane.b32.xlu0 %v180_v16, %s457_s21 }
 0x3cb   :  { %v182_v17 = vpop.permute.xlu0 %181 }
 0x3cc   :  { %v184_v18 = vsel %vm183_vm3, %v182_v17, 0.0 }
 0x3cd   :  { %v185_v19 = vadd.f32 %v184_v18, %v180_v16 }
 0x3cf   :  { %186 = vrot.lane.b32.xlu1 %v185_v19, %s458_s22 }
 0x441   :  { %v187_v20 = vpop.permute.xlu1 %186 }
 0x442   :  { %v189_v21 = vsel %vm188_vm4, %v187_v20, 0.0 }
 0x443   :  { %v190_v22 = vadd.f32 %v189_v21, %v185_v19 }
 0x445   :  { %191 = vrot.lane.b32.xlu1 %v190_v22, %s459_s23 }
 0x4b7   :  { %v192_v23 = vpop.permute.xlu1 %191 }
 0x4b8   :  { %v194_v24 = vsel %vm193_vm5, %v192_v23, 0.0 }
 0x4b9   :  { %v195_v25 = vadd.f32 %v194_v24, %v190_v22 }
 0x4bb   :  { %196 = vrot.lane.b32.xlu1 %v195_v25, %s460_s24 }
 0x52d   :  { %v197_v26 = vpop.permute.xlu1 %196 }
 0x52e   :  { %v199_v27 = vsel %vm198_vm6, %v197_v26, 0.0 }
 0x52f   :  { %v200_v28 = vadd.f32 %v199_v27, %v195_v25 }
 0x531   :  { %201 = vrot.lane.b32.xlu1 %v200_v28, %s461_s25 }
 0x5a3   :  { %v202_v29 = vpop.permute.xlu1 %201 }
 0x5a4   :  { %v204_v31 = vsel %vm203_vm7, %v202_v29, 0.0 }
 0x5a5   :  { %v205_v32 = vadd.f32 %v204_v31, %v200_v28 }
 0x5a7   :  { %vm207_vm9 = vcmp.lt.f32.partialorder %v205_v32, %v206_v30 }
 0x5a8   :  { %vm209_vm11 = vmor %vm207_vm9, %vm208_vm8 }
 0x5a9   :  { %v210_v33 = vsel %vm209_vm11, %v161_v2, -1000.0 }
 0x5aa   :  { %v212_v34 = vsel %vm211_vm10, %v210_v33, -inf }
 0x5ab   :  { %v214_v35 = vsel %vm213_vm12, %v212_v34, -inf }
 0x5ac   :  { %215 = vmax.xlane.f32.xlu1 %v214_v35 }
 0x635   :  { %v216_v36 = vpop.xlane.xlu1 %215 }
 0x636   :  { %v217_v37 = vsub.f32 %v212_v34, %v216_v36 }
 0x638   :  { %v218_v38 = vmul.f32 1.442695, %v217_v37 }
 0x63a   :  { %336 = vpow2.f32 %v218_v38 }
 0x647   :  { %v337_v39 = vpop.eup %336 }
 0x648   :  { %v220_v40 = vsel %vm213_vm12, %v337_v39, 0.0 }
 0x649   :  { %221 = vadd.xlane.f32.xlu0 %v220_v40 }
 0x64a   :  { %383 = shalt.err (!%p380_p1)
}
 0x64b   :  { %246 = dma.vmem_to_hbm [thread:$0]  %s244_s28, 16, %s568_s6, [#allocation14]  }
 0x64c   :  { %s463_s0 = smov [#allocation12]  }
 0x64d   :  { %s233_s8 = sshll.u32 %s463_s0, 4  ;;  %s234_s8 = int_to_ptr.vmem [resolvable:$true] %s233_s8 }
 0x64e   :  { %s392_s9 = scalar_lea.vmem %s234_s8, 16  ;;  %s396_s10 = scalar_lea.vmem %s234_s8, 32 }
 0x64f   :  { %p393_p2 = scmp.ne.s32.totalorder %s234_s8, %s392_s9  ;;  %p397_p3 = scmp.lt.s32.totalorder %s234_s8, %s234_s8 }
 0x650   :  { %p398_p4 = scmp.lt.s32.totalorder %s396_s10, %s392_s9 }
 0x652   :  { %p399_p5 = por %p398_p4, %p397_p3 }
 0x654   :  { %p400_p6 = pnand %p399_p5, %p393_p2 }
 0x6d2   :  { %v222_v5 = vpop.xlane.xlu0 %221 }
 0x6d3   :  { %338 = vrcp.f32 %v222_v5 }
 0x6e0   :  { %v339_v41 = vpop.eup %338 }
 0x6e1   :  { %v224_v42 = vmul.f32 %v339_v41, %v337_v39 }
 0x6e3   :  { %225 = vst [vmem:[#allocation12] sm:$0x1] %v224_v42 }
 0x6e4   :  { %403 = shalt.err (!%p400_p6)
}
 0x6e5   :  { %236 = dma.vmem_to_hbm [thread:$0]  %s234_s8, 16, %s567_s5, [#allocation9]  }
 0x6e6   :  { %432 = dma.done.wait [#allocation9], 16  }
 0x6e7   :  { %433 = vsyncadd [#allocation9], 4294967280 }
 0x6e8   :  { %434 = dma.done.wait [#allocation14], 16  }
 0x6e9   :  { %435 = vsyncadd [#allocation14], 4294967280 }
 0x6ea   :  { %253 = vsyncpa [#allocation8], 1 }
 0x6eb   :  { %254 = vsyncpa [#allocation9], 1 }
 0x6ec   :  { %255 = vsyncpa [#allocation14], 1 }
 0x6ed   :  { %256 = vsyncpa [#allocation10], 1 }

</bundles_post_ra>
